<compile_context>
chip_gen: v5e
topology: v5e:2x2
jax: 0.10.0
libtpu: 0.0.40
codegen_flags: <defaults>
</compile_context>

<pallas_src>
import functools

import jax
import jax.numpy as jnp
from jax.experimental import pallas as pl
from jax.experimental.pallas import tpu as pltpu

INPUT_DIM = 768
HIDDEN_DIM = 256
LATENT_DIM = 64


def _autoencoder_kernel(x_ref,
                        w1_ref, b1_ref,
                        w2_ref, b2_ref,
                        w3_ref, b3_ref,
                        w4_ref, b4_ref,
                        o_ref):
    """Fused 4-layer MLP (2 encoder + 2 decoder linears) for one batch tile.

    Matmul operands are bf16 (MXU-native on v6e/v7x); accumulation, bias add
    and ReLU stay f32; the result is cast to o_ref.dtype (== input dtype).
    """
    x = x_ref[...].astype(jnp.bfloat16)

    # encoder layer 1: Linear(768 -> 256) + ReLU
    h1 = jnp.dot(x, w1_ref[...], preferred_element_type=jnp.float32) + b1_ref[...]
    h1 = jnp.maximum(h1, 0.0).astype(jnp.bfloat16)

    # encoder layer 2: Linear(256 -> 64) + ReLU
    h2 = jnp.dot(h1, w2_ref[...], preferred_element_type=jnp.float32) + b2_ref[...]
    h2 = jnp.maximum(h2, 0.0).astype(jnp.bfloat16)

    # decoder layer 1: Linear(64 -> 256) + ReLU
    h3 = jnp.dot(h2, w3_ref[...], preferred_element_type=jnp.float32) + b3_ref[...]
    h3 = jnp.maximum(h3, 0.0).astype(jnp.bfloat16)

    # decoder layer 2: Linear(256 -> 768), no activation
    out = jnp.dot(h3, w4_ref[...], preferred_element_type=jnp.float32) + b4_ref[...]
    o_ref[...] = out.astype(o_ref.dtype)


def _round_up(x, m):
    return ((x + m - 1) // m) * m


def _choose_batch_tile(batch, block_b):
    """Batch-tile size: >=2 (even) grid steps for v7x megacore, multiple of 8,
    capped at min(block_b, 1024), near-even split of `batch` to bound padding."""
    block_b = max(8, min(block_b, 1024))          # 1024 cap keeps v7x (64 MiB VMEM) safe
    n_tiles = max(2, -(-batch // block_b))        # >= 2 steps -> both v7x TensorCores busy
    if n_tiles % 2:
        n_tiles += 1                              # even step count balances the two TCs
    return max(8, _round_up(-(-batch // n_tiles), 8))


@functools.partial(jax.jit, static_argnames=("block_b",))
def autoencoder_forward(x, params, *, block_b=512):
    """x: [B, 768] (f32 or bf16). params: dict of weights/biases. Returns [B, 768] in x.dtype."""
    B, D = x.shape
    assert D == INPUT_DIM

    blk = _choose_batch_tile(B, block_b)
    pad = (-B) % blk
    if pad:
        x = jnp.pad(x, ((0, pad), (0, 0)))
    Bp = B + pad
    grid = (Bp // blk,)

    # Weights go in as bf16 MXU operands (no-op if already bf16); biases stay f32.
    w1 = params["w1"].astype(jnp.bfloat16)
    w2 = params["w2"].astype(jnp.bfloat16)
    w3 = params["w3"].astype(jnp.bfloat16)
    w4 = params["w4"].astype(jnp.bfloat16)
    b1 = params["b1"].astype(jnp.float32)
    b2 = params["b2"].astype(jnp.float32)
    b3 = params["b3"].astype(jnp.float32)
    b4 = params["b4"].astype(jnp.float32)

    def resident(shape):
        # Constant index_map -> DMA'd once, stays VMEM-resident across all
        # batch-tile steps; Buffered(1) drops the redundant second buffer.
        return pl.BlockSpec(shape, lambda i: (0, 0), pipeline_mode=pl.Buffered(1))

    io_itemsize = jnp.dtype(x.dtype).itemsize
    flops_per_row = 2 * (INPUT_DIM * HIDDEN_DIM + HIDDEN_DIM * LATENT_DIM
                         + LATENT_DIM * HIDDEN_DIM + HIDDEN_DIM * INPUT_DIM)
    weight_bytes = 2 * (INPUT_DIM * HIDDEN_DIM + HIDDEN_DIM * LATENT_DIM
                        + LATENT_DIM * HIDDEN_DIM + HIDDEN_DIM * INPUT_DIM)
    bias_bytes = 4 * (HIDDEN_DIM + LATENT_DIM + HIDDEN_DIM + INPUT_DIM)
    cost = pl.CostEstimate(
        flops=Bp * flops_per_row,
        transcendentals=0,
        bytes_accessed=2 * Bp * INPUT_DIM * io_itemsize + weight_bytes + bias_bytes,
    )

    out = pl.pallas_call(
        _autoencoder_kernel,
        out_shape=jax.ShapeDtypeStruct((Bp, INPUT_DIM), x.dtype),
        grid_spec=pltpu.PrefetchScalarGridSpec(
            num_scalar_prefetch=0,
            grid=grid,
            in_specs=[
                pl.BlockSpec((blk, INPUT_DIM), lambda i: (i, 0)),            # x tile
                resident((INPUT_DIM, HIDDEN_DIM)), resident((1, HIDDEN_DIM)),  # w1, b1
                resident((HIDDEN_DIM, LATENT_DIM)), resident((1, LATENT_DIM)), # w2, b2
                resident((LATENT_DIM, HIDDEN_DIM)), resident((1, HIDDEN_DIM)), # w3, b3
                resident((HIDDEN_DIM, INPUT_DIM)), resident((1, INPUT_DIM)),   # w4, b4
            ],
            out_specs=pl.BlockSpec((blk, INPUT_DIM), lambda i: (i, 0)),
        ),
        compiler_params=pltpu.CompilerParams(
            dimension_semantics=("parallel",),
            vmem_limit_bytes=32 * 1024 * 1024,
        ),
        cost_estimate=cost,
    )(x, w1, b1, w2, b2, w3, b3, w4, b4)

    return out[:B] if pad else out


def init_params(key):
    """Deterministic parameter init (PyTorch-Linear-style uniform fan-in)."""
    ks = jax.random.split(key, 8)

    def linear(kw, kb, fan_in, fan_out):
        bound = 1.0 / jnp.sqrt(fan_in)
        w = jax.random.uniform(kw, (fan_in, fan_out), jnp.float32, -bound, bound)
        b = jax.random.uniform(kb, (1, fan_out), jnp.float32, -bound, bound)
        return w, b

    w1, b1 = linear(ks[0], ks[1], INPUT_DIM, HIDDEN_DIM)
    w2, b2 = linear(ks[2], ks[3], HIDDEN_DIM, LATENT_DIM)
    w3, b3 = linear(ks[4], ks[5], LATENT_DIM, HIDDEN_DIM)
    w4, b4 = linear(ks[6], ks[7], HIDDEN_DIM, INPUT_DIM)
    return dict(w1=w1, b1=b1, w2=w2, b2=b2, w3=w3, b3=b3, w4=w4, b4=b4)


def reference_forward_bf16(x, p):
    """Pure-JAX reference using the same bf16-operand / f32-accumulate recipe."""
    def lin(h, w, b, relu):
        y = jnp.dot(h.astype(jnp.bfloat16), w.astype(jnp.bfloat16),
                    preferred_element_type=jnp.float32) + b
        return jnp.maximum(y, 0.0) if relu else y

    h = lin(x, p["w1"], p["b1"], True)
    h = lin(h, p["w2"], p["b2"], True)
    h = lin(h, p["w3"], p["b3"], True)
    return lin(h, p["w4"], p["b4"], False)


def reference_forward_f32(x, p):
    """Pure-f32 reference matching the PyTorch module exactly."""
    def lin(h, w, b, relu):
        y = jnp.dot(h, w, preferred_element_type=jnp.float32) + b
        return jnp.maximum(y, 0.0) if relu else y

    h = lin(x, p["w1"], p["b1"], True)
    h = lin(h, p["w2"], p["b2"], True)
    h = lin(h, p["w3"], p["b3"], True)
    return lin(h, p["w4"], p["b4"], False)


if __name__ == "__main__":
    key = jax.random.PRNGKey(0)
    k_param, k_x = jax.random.split(key)

    params = init_params(k_param)
    batch = 16
    x = jax.random.normal(k_x, (batch, INPUT_DIM), dtype=jnp.float32)

    # f32-I/O path (matches the PyTorch module's dtype).  Tile chooser gives
    # two 8-row grid steps here, so a v7x megacore uses both TensorCores.
    out = jax.block_until_ready(autoencoder_forward(x, params))
    assert out.shape == (batch, INPUT_DIM) and out.dtype == jnp.float32

    ref_bf16 = reference_forward_bf16(x, params)
    ref_f32 = reference_forward_f32(x, params)
    assert jnp.allclose(out, ref_bf16, atol=1e-2, rtol=1e-2), "mismatch vs bf16-recipe reference"
    assert jnp.allclose(out, ref_f32, atol=1e-1, rtol=1e-1), "mismatch vs f32 reference"

    # bf16-I/O path (halves HBM traffic on this bandwidth-bound kernel).
    x_bf16 = x.astype(jnp.bfloat16)
    out_bf16 = jax.block_until_ready(autoencoder_forward(x_bf16, params))
    assert out_bf16.dtype == jnp.bfloat16
    assert jnp.allclose(out_bf16.astype(jnp.float32), ref_f32, atol=2e-1, rtol=2e-1), \
        "bf16-I/O mismatch vs f32 reference"

    print("KERNEL_OK")
</pallas_src>

<mosaic_0001>
module attributes {stable_mosaic.version = 11 : i64} {
  func.func @_autoencoder_kernel(%arg0: i32, %arg1: memref<8x768xf32, #tpu.memory_space<vmem>>, %arg2: memref<768x256xbf16, #tpu.memory_space<vmem>>, %arg3: memref<1x256xf32, #tpu.memory_space<vmem>>, %arg4: memref<256x64xbf16, #tpu.memory_space<vmem>>, %arg5: memref<1x64xf32, #tpu.memory_space<vmem>>, %arg6: memref<64x256xbf16, #tpu.memory_space<vmem>>, %arg7: memref<1x256xf32, #tpu.memory_space<vmem>>, %arg8: memref<256x768xbf16, #tpu.memory_space<vmem>>, %arg9: memref<1x768xf32, #tpu.memory_space<vmem>>, %arg10: memref<8x768xf32, #tpu.memory_space<vmem>>) attributes {dimension_semantics = [#tpu.dimension_semantics<parallel>], iteration_bounds = array<i64: 2>, scalar_prefetch = 0 : i64, scratch_operands = 0 : i64, tpu.core_type = #tpu.core_type<tc>, window_params = [{transform_indices = @transform_0, window_bounds = array<i64: 8, 768>}, {pipeline_mode = #tpu.pipeline_mode<synchronous>, transform_indices = @transform_1, window_bounds = array<i64: 768, 256>}, {pipeline_mode = #tpu.pipeline_mode<synchronous>, transform_indices = @transform_2, window_bounds = array<i64: 1, 256>}, {pipeline_mode = #tpu.pipeline_mode<synchronous>, transform_indices = @transform_3, window_bounds = array<i64: 256, 64>}, {pipeline_mode = #tpu.pipeline_mode<synchronous>, transform_indices = @transform_4, window_bounds = array<i64: 1, 64>}, {pipeline_mode = #tpu.pipeline_mode<synchronous>, transform_indices = @transform_5, window_bounds = array<i64: 64, 256>}, {pipeline_mode = #tpu.pipeline_mode<synchronous>, transform_indices = @transform_6, window_bounds = array<i64: 1, 256>}, {pipeline_mode = #tpu.pipeline_mode<synchronous>, transform_indices = @transform_7, window_bounds = array<i64: 256, 768>}, {pipeline_mode = #tpu.pipeline_mode<synchronous>, transform_indices = @transform_8, window_bounds = array<i64: 1, 768>}, {transform_indices = @transform_9, window_bounds = array<i64: 8, 768>}]} {
    %c0 = arith.constant 0 : index
    %c0_0 = arith.constant 0 : index
    %0 = vector.load %arg1[%c0, %c0_0] : memref<8x768xf32, #tpu.memory_space<vmem>>, vector<8x768xf32>
    %1 = arith.truncf %0 : vector<8x768xf32> to vector<8x768xbf16>
    %c0_1 = arith.constant 0 : index
    %c0_2 = arith.constant 0 : index
    %2 = vector.load %arg2[%c0_1, %c0_2] : memref<768x256xbf16, #tpu.memory_space<vmem>>, vector<768x256xbf16>
    %cst = arith.constant dense<0.000000e+00> : vector<8x256xf32>
    %3 = tpu.matmul %1, %2, %cst {dimension_numbers = #tpu.dot_dimension_numbers<[1], [0], [0], [1], [0, 0, 1, 1], [], []>} : vector<8x768xbf16>, vector<768x256xbf16>, vector<8x256xf32> -> vector<8x256xf32>
    %c0_3 = arith.constant 0 : index
    %c0_4 = arith.constant 0 : index
    %4 = vector.load %arg3[%c0_3, %c0_4] : memref<1x256xf32, #tpu.memory_space<vmem>>, vector<1x256xf32>
    %5 = vector.broadcast %4 : vector<1x256xf32> to vector<8x256xf32>
    %6 = arith.addf %3, %5 : vector<8x256xf32>
    %cst_5 = arith.constant 0.000000e+00 : f32
    %7 = vector.broadcast %cst_5 : f32 to vector<8x256xf32>
    %8 = arith.maximumf %6, %7 : vector<8x256xf32>
    %9 = arith.truncf %8 : vector<8x256xf32> to vector<8x256xbf16>
    %c0_6 = arith.constant 0 : index
    %c0_7 = arith.constant 0 : index
    %10 = vector.load %arg4[%c0_6, %c0_7] : memref<256x64xbf16, #tpu.memory_space<vmem>>, vector<256x64xbf16>
    %cst_8 = arith.constant dense<0.000000e+00> : vector<8x64xf32>
    %11 = tpu.matmul %9, %10, %cst_8 {dimension_numbers = #tpu.dot_dimension_numbers<[1], [0], [0], [1], [0, 0, 1, 1], [], []>} : vector<8x256xbf16>, vector<256x64xbf16>, vector<8x64xf32> -> vector<8x64xf32>
    %c0_9 = arith.constant 0 : index
    %c0_10 = arith.constant 0 : index
    %12 = vector.load %arg5[%c0_9, %c0_10] : memref<1x64xf32, #tpu.memory_space<vmem>>, vector<1x64xf32>
    %13 = vector.broadcast %12 : vector<1x64xf32> to vector<8x64xf32>
    %14 = arith.addf %11, %13 : vector<8x64xf32>
    %cst_11 = arith.constant 0.000000e+00 : f32
    %15 = vector.broadcast %cst_11 : f32 to vector<8x64xf32>
    %16 = arith.maximumf %14, %15 : vector<8x64xf32>
    %17 = arith.truncf %16 : vector<8x64xf32> to vector<8x64xbf16>
    %c0_12 = arith.constant 0 : index
    %c0_13 = arith.constant 0 : index
    %18 = vector.load %arg6[%c0_12, %c0_13] : memref<64x256xbf16, #tpu.memory_space<vmem>>, vector<64x256xbf16>
    %cst_14 = arith.constant dense<0.000000e+00> : vector<8x256xf32>
    %19 = tpu.matmul %17, %18, %cst_14 {dimension_numbers = #tpu.dot_dimension_numbers<[1], [0], [0], [1], [0, 0, 1, 1], [], []>} : vector<8x64xbf16>, vector<64x256xbf16>, vector<8x256xf32> -> vector<8x256xf32>
    %c0_15 = arith.constant 0 : index
    %c0_16 = arith.constant 0 : index
    %20 = vector.load %arg7[%c0_15, %c0_16] : memref<1x256xf32, #tpu.memory_space<vmem>>, vector<1x256xf32>
    %21 = vector.broadcast %20 : vector<1x256xf32> to vector<8x256xf32>
    %22 = arith.addf %19, %21 : vector<8x256xf32>
    %cst_17 = arith.constant 0.000000e+00 : f32
    %23 = vector.broadcast %cst_17 : f32 to vector<8x256xf32>
    %24 = arith.maximumf %22, %23 : vector<8x256xf32>
    %25 = arith.truncf %24 : vector<8x256xf32> to vector<8x256xbf16>
    %c0_18 = arith.constant 0 : index
    %c0_19 = arith.constant 0 : index
    %26 = vector.load %arg8[%c0_18, %c0_19] : memref<256x768xbf16, #tpu.memory_space<vmem>>, vector<256x768xbf16>
    %cst_20 = arith.constant dense<0.000000e+00> : vector<8x768xf32>
    %27 = tpu.matmul %25, %26, %cst_20 {dimension_numbers = #tpu.dot_dimension_numbers<[1], [0], [0], [1], [0, 0, 1, 1], [], []>} : vector<8x256xbf16>, vector<256x768xbf16>, vector<8x768xf32> -> vector<8x768xf32>
    %c0_21 = arith.constant 0 : index
    %c0_22 = arith.constant 0 : index
    %28 = vector.load %arg9[%c0_21, %c0_22] : memref<1x768xf32, #tpu.memory_space<vmem>>, vector<1x768xf32>
    %29 = vector.broadcast %28 : vector<1x768xf32> to vector<8x768xf32>
    %30 = arith.addf %27, %29 : vector<8x768xf32>
    %c0_23 = arith.constant 0 : index
    %c0_24 = arith.constant 0 : index
    %31 = vector.load %arg10[%c0_23, %c0_24] : memref<8x768xf32, #tpu.memory_space<vmem>>, vector<8x768xf32>
    tpu.vector_store %arg10[%c0_23, %c0_24], %30 {strides = array<i32>} : memref<8x768xf32, #tpu.memory_space<vmem>>, vector<8x768xf32>,
    return
  }
  func.func @transform_0(%arg0: i32) -> (i32, i32) {
    %c0_i32 = arith.constant 0 : i32
    %c0_i32_0 = arith.constant 0 : i32
    return %arg0, %c0_i32 : i32, i32
  }
  func.func @transform_1(%arg0: i32) -> (i32, i32) {
    %c0_i32 = arith.constant 0 : i32
    %c0_i32_0 = arith.constant 0 : i32
    %c0_i32_1 = arith.constant 0 : i32
    return %c0_i32, %c0_i32_0 : i32, i32
  }
  func.func @transform_2(%arg0: i32) -> (i32, i32) {
    %c0_i32 = arith.constant 0 : i32
    %c0_i32_0 = arith.constant 0 : i32
    %c0_i32_1 = arith.constant 0 : i32
    return %c0_i32, %c0_i32_0 : i32, i32
  }
  func.func @transform_3(%arg0: i32) -> (i32, i32) {
    %c0_i32 = arith.constant 0 : i32
    %c0_i32_0 = arith.constant 0 : i32
    %c0_i32_1 = arith.constant 0 : i32
    return %c0_i32, %c0_i32_0 : i32, i32
  }
  func.func @transform_4(%arg0: i32) -> (i32, i32) {
    %c0_i32 = arith.constant 0 : i32
    %c0_i32_0 = arith.constant 0 : i32
    %c0_i32_1 = arith.constant 0 : i32
    return %c0_i32, %c0_i32_0 : i32, i32
  }
  func.func @transform_5(%arg0: i32) -> (i32, i32) {
    %c0_i32 = arith.constant 0 : i32
    %c0_i32_0 = arith.constant 0 : i32
    %c0_i32_1 = arith.constant 0 : i32
    return %c0_i32, %c0_i32_0 : i32, i32
  }
  func.func @transform_6(%arg0: i32) -> (i32, i32) {
    %c0_i32 = arith.constant 0 : i32
    %c0_i32_0 = arith.constant 0 : i32
    %c0_i32_1 = arith.constant 0 : i32
    return %c0_i32, %c0_i32_0 : i32, i32
  }
  func.func @transform_7(%arg0: i32) -> (i32, i32) {
    %c0_i32 = arith.constant 0 : i32
    %c0_i32_0 = arith.constant 0 : i32
    %c0_i32_1 = arith.constant 0 : i32
    return %c0_i32, %c0_i32_0 : i32, i32
  }
  func.func @transform_8(%arg0: i32) -> (i32, i32) {
    %c0_i32 = arith.constant 0 : i32
    %c0_i32_0 = arith.constant 0 : i32
    %c0_i32_1 = arith.constant 0 : i32
    return %c0_i32, %c0_i32_0 : i32, i32
  }
  func.func @transform_9(%arg0: i32) -> (i32, i32) {
    %c0_i32 = arith.constant 0 : i32
    %c0_i32_0 = arith.constant 0 : i32
    return %arg0, %c0_i32 : i32, i32
  }
}

</mosaic_0001>

<bundles_post_ra>
// kernel: autoencoder_forward.1
= control target key start
LH: loop header
LB: loop body
LE: loop exit
PB: predicated region body
PF: predicated region fallthrough
CT: control target
= control target key end

     0   :  { %14 = vsyncpa [#allocation3], 0  ;;  %s4820_s0 = inlined_call_operand.vmem [shape: f32[16,768], index: 0, kind: input, shape index: {}]   ;;  %s4821_s1 = inlined_call_operand.vmem [shape: bf16[768,256], index: 1, kind: input, shape index: {}]   ;;  %s4822_s2 = inlined_call_operand.vmem [shape: f32[1,256], index: 2, kind: input, shape index: {}]   ;;  %s4823_s3 = inlined_call_operand.vmem [shape: bf16[256,64], index: 3, kind: input, shape index: {}]   ;;  %s4824_s4 = inlined_call_operand.vmem [shape: f32[1,64], index: 4, kind: input, shape index: {}]   ;;  %s4825_s5 = inlined_call_operand.vmem [shape: bf16[64,256], index: 5, kind: input, shape index: {}]   ;;  %s4826_s6 = inlined_call_operand.vmem [shape: f32[1,256], index: 6, kind: input, shape index: {}]   ;;  %s4827_s7 = inlined_call_operand.vmem [shape: bf16[256,768], index: 7, kind: input, shape index: {}]   ;;  %s4828_s8 = inlined_call_operand.vmem [shape: f32[1,768], index: 8, kind: input, shape index: {}]   ;;  %s4829_s9 = inlined_call_operand.hbm [shape: f32[16,768], index: 9, kind: output, shape index: {}]  }
   0x1   :  { %16 = vsyncpa [#allocation3 + $0x1], 0  ;;  %s3409_s30 = smov 0   ;;  %s3411_s10 = smov 0  }
   0x2   :  { %s3413_s11 = smov 0   ;;  %s3415_s12 = smov 0  }
   0x3 LB: > { %s3430_s13 = sadd.s32 4294967295, %s3357_s12   ;;  %s2162_s14 = sadd.s32 4294967294, %s3357_s12   ;;  %s3357_s12 = sphi %s3415_s12, %s4835_s12   ;;  %s3353_s11 = sphi %s3413_s11, %s4834_s11   ;;  %s3349_s10 = sphi %s3411_s10, %s4833_s10   ;;  %s3345_s30 = sphi %s3409_s30, %s4832_s30  }
   0x4   : > { %s3434_s15 = sadd.s32 1, %s3357_s12   ;;  %s223_s16 = sadd.s32 1, %s3353_s11 }
   0x5   : > { %s220_s17 = ssub.s32 %s3357_s12, %s3434_s15  ;;  %p233_p0 = scmp.ne.s32.totalorder %s3353_s11, %s3349_s10 }
   0x6   : > { %p221_p1 = scmp.eq.s32.totalorder %s220_s17, 0  ;;  %p234_p2 = scmp.eq.s32.totalorder %s3430_s13, 1 }
   0x7   : > { %p239_p3 = scmp.ne.s32.totalorder %s3349_s10, %s3345_s30  ;;  %p240_p4 = scmp.eq.s32.totalorder %s2162_s14, 1 }
   0x8   : > { %s3445_s18 = scalar_select %p221_p1, %s3353_s11, %s223_s16  }
   0x9   : > { %p3447_p5 = por %p234_p2, %p233_p0  ;;  %p3451_p6 = por %p240_p4, %p239_p3 }
   0xa   : > { %p2165_p7 = scmp.ge.s32.totalorder %s3357_s12, 1  ;;  %p290_p8 = scmp.lt.s32.totalorder %s3357_s12, 3 }
   0xc   : > { %p291_p9 = pnand %p2165_p7, %p290_p8 }
   0xd   : > { %p326_p10 = scmp.lt.s32.totalorder (!%p291_p9), %s3430_s13, 1  ;;  %s323_s24 = sand.u32 (!%p291_p9), 1, %s3349_s10  }
   0xe   : > { %294 = sbr.rel (%p291_p9) target bundleno = 702 (0x2be), region = 56 }
   0xf   : > { %s3252_s25 = smul.u32 (!%p291_p9), 48, %s323_s24 }
  0x11   : > { %s4778_s26 = scalar_lea.vmem (!%p291_p9), [#allocation2], %s3252_s25 }
  0x12   : > { %s2100_s28 = sshll.u32 (!%p291_p9), %s4778_s26, 4  ;;  %s2101_s28 = int_to_ptr.vmem [resolvable:$true] %s2100_s28 }
  0x13   : > { %v2225_v0 = vld [vmem:[%s4821_s1 + $0x70] sm:$0xf]  ;;  %v3051_v1 = vld [vmem:[%s4821_s1 + $0x74] sm:$0xf0]  ;;  %v2217_v11 = vld [vmem:[%s4821_s1 + $0x60] sm:$0xf] }
  0x14   : > { %v2289_v2 = vld [vmem:[%s4821_s1 + $0xf0] sm:$0xf]  ;;  %v2226_v3 = vor.u32 %v3051_v1, %v2225_v0  ;;  %v3067_v4 = vld [vmem:[%s4821_s1 + $0xf4] sm:$0xf0]  ;;  %v3049_v13 = vld [vmem:[%s4821_s1 + $0x64] sm:$0xf0] }
  0x15   : > { %v2353_v5 = vld [vmem:[%s4821_s1 + $0x170] sm:$0xf]  ;;  %v3083_v6 = vld [vmem:[%s4821_s1 + $0x174] sm:$0xf0]  ;;  %v2290_v7 = vor.u32 %v3067_v4, %v2289_v2  ;;  %v2281_v14 = vld [vmem:[%s4821_s1 + $0xe0] sm:$0xf]  ;;  %v2218_v16 = vor.u32 %v3049_v13, %v2217_v11 }
  0x16   : > { %v2354_v8 = vor.u32 %v3083_v6, %v2353_v5  ;;  %v2417_v9 = vld [vmem:[%s4821_s1 + $0x1f0] sm:$0xf]  ;;  %v3099_v10 = vld [vmem:[%s4821_s1 + $0x1f4] sm:$0xf0]  ;;  %926 = vmatpush.bf16.msra.mxu0 %v2226_v3  ;;  %v3065_v15 = vld [vmem:[%s4821_s1 + $0xe4] sm:$0xf0] }
  0x17   : > { %v2418_v12 = vor.u32 %v3099_v10, %v2417_v9  ;;  %939 = vmatpush.bf16.msra.mxu1 %v2290_v7  ;;  %v2282_v17 = vor.u32 %v3065_v15, %v2281_v14  ;;  %v2345_v18 = vld [vmem:[%s4821_s1 + $0x160] sm:$0xf]  ;;  %v3081_v19 = vld [vmem:[%s4821_s1 + $0x164] sm:$0xf0]  ;;  %v2209_v23 = vld [vmem:[%s4821_s1 + $0x50] sm:$0xf] }
  0x18   : > { %952 = vmatpush.bf16.msra.mxu2 %v2354_v8  ;;  %v2409_v20 = vld [vmem:[%s4821_s1 + $0x1e0] sm:$0xf]  ;;  %v2346_v21 = vor.u32 %v3081_v19, %v2345_v18  ;;  %v3097_v22 = vld [vmem:[%s4821_s1 + $0x1e4] sm:$0xf0]  ;;  %v3047_v24 = vld [vmem:[%s4821_s1 + $0x54] sm:$0xf0] }
  0x19   : > { %965 = vmatpush.bf16.msra.mxu3 %v2418_v12  ;;  %v2410_v25 = vor.u32 %v3097_v22, %v2409_v20  ;;  %v2273_v26 = vld [vmem:[%s4821_s1 + $0xd0] sm:$0xf]  ;;  %v3063_v27 = vld [vmem:[%s4821_s1 + $0xd4] sm:$0xf0]  ;;  %v2210_v29 = vor.u32 %v3047_v24, %v2209_v23  ;;  %v2201_v35 = vld [vmem:[%s4821_s1 + $0x40] sm:$0xf] }
  0x1a   : > { %v2337_v28 = vld [vmem:[%s4821_s1 + $0x150] sm:$0xf]  ;;  %927 = vmatpush.bf16.msra.mxu0 %v2218_v16  ;;  %v3079_v30 = vld [vmem:[%s4821_s1 + $0x154] sm:$0xf0]  ;;  %v2274_v33 = vor.u32 %v3063_v27, %v2273_v26  ;;  %v3045_v36 = vld [vmem:[%s4821_s1 + $0x44] sm:$0xf0] }
  0x1b   : > { %v2401_v31 = vld [vmem:[%s4821_s1 + $0x1d0] sm:$0xf]  ;;  %v3095_v32 = vld [vmem:[%s4821_s1 + $0x1d4] sm:$0xf0]  ;;  %940 = vmatpush.bf16.msra.mxu1 %v2282_v17  ;;  %v2338_v34 = vor.u32 %v3079_v30, %v2337_v28  ;;  %v2265_v37 = vld [vmem:[%s4821_s1 + $0xc0] sm:$0xf]  ;;  %v2202_v44 = vor.u32 %v3045_v36, %v2201_v35 }
  0x1c   : > { %953 = vmatpush.bf16.msra.mxu2 %v2346_v21  ;;  %v2402_v38 = vor.u32 %v3095_v32, %v2401_v31  ;;  %v3061_v39 = vld [vmem:[%s4821_s1 + $0xc4] sm:$0xf0]  ;;  %v2329_v40 = vld [vmem:[%s4821_s1 + $0x140] sm:$0xf]  ;;  %v2193_v47 = vld [vmem:[%s4821_s1 + $0x30] sm:$0xf] }
  0x1d   : > { %966 = vmatpush.bf16.msra.mxu3 %v2410_v25  ;;  %v3077_v41 = vld [vmem:[%s4821_s1 + $0x144] sm:$0xf0]  ;;  %v2393_v42 = vld [vmem:[%s4821_s1 + $0x1c0] sm:$0xf]  ;;  %v2266_v45 = vor.u32 %v3061_v39, %v2265_v37  ;;  %v3043_v48 = vld [vmem:[%s4821_s1 + $0x34] sm:$0xf0] }
  0x1e   : > { %v3093_v43 = vld [vmem:[%s4821_s1 + $0x1c4] sm:$0xf0]  ;;  %928 = vmatpush.bf16.msra.mxu0 %v2210_v29  ;;  %v2330_v46 = vor.u32 %v3077_v41, %v2329_v40  ;;  %v2257_v49 = vld [vmem:[%s4821_s1 + $0xb0] sm:$0xf]  ;;  %v3059_v51 = vld [vmem:[%s4821_s1 + $0xb4] sm:$0xf0]  ;;  %v2194_v56 = vor.u32 %v3043_v48, %v2193_v47 }
  0x1f   : > { %941 = vmatpush.bf16.msra.mxu1 %v2274_v33  ;;  %v2394_v50 = vor.u32 %v3093_v43, %v2393_v42  ;;  %v2321_v52 = vld [vmem:[%s4821_s1 + $0x130] sm:$0xf]  ;;  %v3075_v53 = vld [vmem:[%s4821_s1 + $0x134] sm:$0xf0]  ;;  %v2258_v57 = vor.u32 %v3059_v51, %v2257_v49  ;;  %v2185_v59 = vld [vmem:[%s4821_s1 + $0x20] sm:$0xf] }
  0x20   : > { %954 = vmatpush.bf16.msra.mxu2 %v2338_v34  ;;  %v2385_v54 = vld [vmem:[%s4821_s1 + $0x1b0] sm:$0xf]  ;;  %v3091_v55 = vld [vmem:[%s4821_s1 + $0x1b4] sm:$0xf0]  ;;  %v2322_v58 = vor.u32 %v3075_v53, %v2321_v52  ;;  %v3041_v60 = vld [vmem:[%s4821_s1 + $0x24] sm:$0xf0] }
  0x21   : > { %967 = vmatpush.bf16.msra.mxu3 %v2402_v38  ;;  %v2249_v61 = vld [vmem:[%s4821_s1 + $0xa0] sm:$0xf]  ;;  %v2386_v62 = vor.u32 %v3091_v55, %v2385_v54  ;;  %v3057_v63 = vld [vmem:[%s4821_s1 + $0xa4] sm:$0xf0]  ;;  %v2186_v4 = vor.u32 %v3041_v60, %v2185_v59  ;;  %v2177_v7 = vld [vmem:[%s4821_s1 + $0x10] sm:$0xf] }
  0x22   : > { %929 = vmatpush.bf16.msra.mxu0 %v2202_v44  ;;  %v2313_v0 = vld [vmem:[%s4821_s1 + $0x120] sm:$0xf]  ;;  %v3073_v1 = vld [vmem:[%s4821_s1 + $0x124] sm:$0xf0]  ;;  %v2250_v5 = vor.u32 %v3057_v63, %v2249_v61  ;;  %v3039_v8 = vld [vmem:[%s4821_s1 + $0x14] sm:$0xf0] }
  0x23   : > { %942 = vmatpush.bf16.msra.mxu1 %v2266_v45  ;;  %v2377_v2 = vld [vmem:[%s4821_s1 + $0x1a0] sm:$0xf]  ;;  %v3089_v3 = vld [vmem:[%s4821_s1 + $0x1a4] sm:$0xf0]  ;;  %v2314_v6 = vor.u32 %v3073_v1, %v2313_v0  ;;  %v2241_v9 = vld [vmem:[%s4821_s1 + $0x90] sm:$0xf]  ;;  %v2178_v16 = vor.u32 %v3039_v8, %v2177_v7 }
  0x24   : > { %955 = vmatpush.bf16.msra.mxu2 %v2330_v46  ;;  %v2378_v10 = vor.u32 %v3089_v3, %v2377_v2  ;;  %v3055_v11 = vld [vmem:[%s4821_s1 + $0x94] sm:$0xf0]  ;;  %v2305_v12 = vld [vmem:[%s4821_s1 + $0x110] sm:$0xf]  ;;  %v2169_v17 = vld [vmem:[%s4821_s1] sm:$0xf] }
  0x25   : > { %968 = vmatpush.bf16.msra.mxu3 %v2394_v50  ;;  %v3071_v13 = vld [vmem:[%s4821_s1 + $0x114] sm:$0xf0]  ;;  %v2369_v14 = vld [vmem:[%s4821_s1 + $0x190] sm:$0xf]  ;;  %v3037_v18 = vld [vmem:[%s4821_s1 + $0x4] sm:$0xf0]  ;;  %v2242_v19 = vor.u32 %v3055_v11, %v2241_v9 }
  0x26   : > { %930 = vmatpush.bf16.msra.mxu0 %v2194_v56  ;;  %v3087_v15 = vld [vmem:[%s4821_s1 + $0x194] sm:$0xf0]  ;;  %v2306_v20 = vor.u32 %v3071_v13, %v2305_v12  ;;  %v2233_v21 = vld [vmem:[%s4821_s1 + $0x80] sm:$0xf]  ;;  %v3053_v22 = vld [vmem:[%s4821_s1 + $0x84] sm:$0xf0]  ;;  %v2170_v31 = vor.u32 %v3037_v18, %v2169_v17 }
  0x27   : > { %943 = vmatpush.bf16.msra.mxu1 %v2258_v57  ;;  %v2297_v23 = vld [vmem:[%s4821_s1 + $0x100] sm:$0xf]  ;;  %v2370_v24 = vor.u32 %v3087_v15, %v2369_v14  ;;  %v3069_v25 = vld [vmem:[%s4821_s1 + $0x104] sm:$0xf0]  ;;  %v2481_v28 = vld [vmem:[%s4821_s1 + $0x270] sm:$0xf]  ;;  %v2234_v35 = vor.u32 %v3053_v22, %v2233_v21 }
  0x28   : > { %956 = vmatpush.bf16.msra.mxu2 %v2322_v58  ;;  %v2361_v26 = vld [vmem:[%s4821_s1 + $0x180] sm:$0xf]  ;;  %v3085_v27 = vld [vmem:[%s4821_s1 + $0x184] sm:$0xf0]  ;;  %v3115_v29 = vld [vmem:[%s4821_s1 + $0x274] sm:$0xf0]  ;;  %v2298_v36 = vor.u32 %v3069_v25, %v2297_v23 }
  0x29   : > { %969 = vmatpush.bf16.msra.mxu3 %v2386_v62  ;;  %v2545_v30 = vld [vmem:[%s4821_s1 + $0x2f0] sm:$0xf]  ;;  %v3131_v32 = vld [vmem:[%s4821_s1 + $0x2f4] sm:$0xf0]  ;;  %v3050_v33 = vld [vmem:[%s4821_s1 + $0x74] sm:$0xf]  ;;  %v2362_v39 = vor.u32 %v3085_v27, %v2361_v26  ;;  %v2482_v40 = vor.u32 %v3115_v29, %v2481_v28 }
  0x2a   : > { %931 = vmatpush.bf16.msra.mxu0 %v2186_v4  ;;  %v2227_v34 = vld [vmem:[%s4821_s1 + $0x78] sm:$0xf0]  ;;  %v3066_v37 = vld [vmem:[%s4821_s1 + $0xf4] sm:$0xf]  ;;  %v2546_v41 = vor.u32 %v3131_v32, %v2545_v30  ;;  %v2473_v43 = vld [vmem:[%s4821_s1 + $0x260] sm:$0xf] }
  0x2b   : > { %944 = vmatpush.bf16.msra.mxu1 %v2250_v5  ;;  %v2291_v38 = vld [vmem:[%s4821_s1 + $0xf8] sm:$0xf0]  ;;  %v2230_v42 = vor.u32 %v3050_v33, %v2227_v34  ;;  %v3113_v44 = vld [vmem:[%s4821_s1 + $0x264] sm:$0xf0]  ;;  %v2537_v45 = vld [vmem:[%s4821_s1 + $0x2e0] sm:$0xf] }
  0x2c   : > { %957 = vmatpush.bf16.msra.mxu2 %v2314_v6  ;;  %v2294_v46 = vor.u32 %v3066_v37, %v2291_v38  ;;  %v3129_v47 = vld [vmem:[%s4821_s1 + $0x2e4] sm:$0xf0]  ;;  %v3048_v48 = vld [vmem:[%s4821_s1 + $0x64] sm:$0xf]  ;;  %v2219_v49 = vld [vmem:[%s4821_s1 + $0x68] sm:$0xf0]  ;;  %v2474_v52 = vor.u32 %v3113_v44, %v2473_v43 }
  0x2d   : > { %970 = vmatpush.bf16.msra.mxu3 %v2378_v10  ;;  %v3064_v50 = vld [vmem:[%s4821_s1 + $0xe4] sm:$0xf]  ;;  %v2283_v51 = vld [vmem:[%s4821_s1 + $0xe8] sm:$0xf0]  ;;  %v2465_v53 = vld [vmem:[%s4821_s1 + $0x250] sm:$0xf]  ;;  %v2538_v54 = vor.u32 %v3129_v47, %v2537_v45  ;;  %v2222_v55 = vor.u32 %v3048_v48, %v2219_v49 }
  0x2e   : > { %932 = vmatpush.bf16.msra.mxu0 %v2178_v16  ;;  %v3111_v56 = vld [vmem:[%s4821_s1 + $0x254] sm:$0xf0]  ;;  %v2529_v57 = vld [vmem:[%s4821_s1 + $0x2d0] sm:$0xf]  ;;  %s327_s16 = scalar_select %p326_p10, %s3430_s13, 1  ;;  %v2286_v58 = vor.u32 %v3064_v50, %v2283_v51  ;;  %vm1300_vm0 = vcmask 523264  }
  0x2f   : > { %945 = vmatpush.bf16.msra.mxu1 %v2242_v19  ;;  %v3127_v59 = vld [vmem:[%s4821_s1 + $0x2d4] sm:$0xf0]  ;;  %v3046_v60 = vld [vmem:[%s4821_s1 + $0x54] sm:$0xf]  ;;  %v2211_v61 = vld [vmem:[%s4821_s1 + $0x58] sm:$0xf0]  ;;  %v2466_v0 = vor.u32 %v3111_v56, %v2465_v53 }
  0x30   : > { %958 = vmatpush.bf16.msra.mxu2 %v2306_v20  ;;  %v3062_v62 = vld [vmem:[%s4821_s1 + $0xd4] sm:$0xf]  ;;  %v2275_v63 = vld [vmem:[%s4821_s1 + $0xd8] sm:$0xf0]  ;;  %s3253_s14 = smul.u32 48, %s327_s16  ;;  %v2530_v4 = vor.u32 %v3127_v59, %v2529_v57  ;;  %v2214_v5 = vor.u32 %v3046_v60, %v2211_v61 }
  0x31   : > { %971 = vmatpush.bf16.msra.mxu3 %v2370_v24  ;;  %v2457_v1 = vld [vmem:[%s4821_s1 + $0x240] sm:$0xf]  ;;  %v3109_v2 = vld [vmem:[%s4821_s1 + $0x244] sm:$0xf0]  ;;  %v3044_v7 = vld [vmem:[%s4821_s1 + $0x44] sm:$0xf]  ;;  %v2278_v9 = vor.u32 %v3062_v62, %v2275_v63 }
  0x32   : > { %933 = vmatpush.bf16.msra.mxu0 %v2170_v31  ;;  %v2521_v3 = vld [vmem:[%s4821_s1 + $0x2c0] sm:$0xf]  ;;  %v3125_v6 = vld [vmem:[%s4821_s1 + $0x2c4] sm:$0xf0]  ;;  %v2203_v8 = vld [vmem:[%s4821_s1 + $0x48] sm:$0xf0]  ;;  %s3744_s23 = scalar_lea.vmem %s4820_s0, %s3253_s14  ;;  %v2458_v19 = vor.u32 %v3109_v2, %v2457_v1 }
  0x33   : > { %946 = vmatpush.bf16.msra.mxu1 %v2234_v35  ;;  %v332_v10 = vld [vmem:[%s3744_s23] sm:$0xff]  ;;  %v333_v11 = vld [vmem:[%s3744_s23 + $0x8] sm:$0xff]  ;;  %v334_v12 = vld [vmem:[%s3744_s23 + $0x10] sm:$0xff]  ;;  %v2522_v21 = vor.u32 %v3125_v6, %v2521_v3  ;;  %v2206_v22 = vor.u32 %v3044_v7, %v2203_v8 }
  0x34   : > { %959 = vmatpush.bf16.msra.mxu2 %v2298_v36  ;;  %v3060_v13 = vld [vmem:[%s4821_s1 + $0xc4] sm:$0xf]  ;;  %v2267_v14 = vld [vmem:[%s4821_s1 + $0xc8] sm:$0xf0]  ;;  %v3755_v15 = vpack.c.bf16 %v332_v10, %v332_v10  ;;  %v3757_v16 = vpack.c.bf16 %v333_v11, %v333_v11  ;;  %v3759_v17 = vpack.c.bf16 %v334_v12, %v334_v12  ;;  %v335_v18 = vld [vmem:[%s3744_s23 + $0x18] sm:$0xff] }
  0x35   : > { %972 = vmatpush.bf16.msra.mxu3 %v2362_v39  ;;  %v3762_v20 = vpack.c.bf16 %v335_v18, %v335_v18  ;;  %v2449_v23 = vld [vmem:[%s4821_s1 + $0x230] sm:$0xf]  ;;  %v3107_v24 = vld [vmem:[%s4821_s1 + $0x234] sm:$0xf0]  ;;  %v2270_v26 = vor.u32 %v3060_v13, %v2267_v14  ;;  %v3042_v28 = vld [vmem:[%s4821_s1 + $0x34] sm:$0xf] }
  0x36   : > { %978 = vmatpush.bf16.msrb.mxu0 %v2482_v40  ;;  %v2513_v25 = vld [vmem:[%s4821_s1 + $0x2b0] sm:$0xf]  ;;  %v3123_v27 = vld [vmem:[%s4821_s1 + $0x2b4] sm:$0xf0]  ;;  %v2195_v29 = vld [vmem:[%s4821_s1 + $0x38] sm:$0xf0]  ;;  %947 = vmatmul.bf16.vlgmr.msra.gmra.mxu1 %v3757_v16  ;;  %v2450_v32 = vor.u32 %v3107_v24, %v2449_v23 }
  0x37   : > { %991 = vmatpush.bf16.msrb.mxu1 %v2546_v41  ;;  %934 = vmatmul.bf16.vlgmr.msra.gmra.mxu0 %v3755_v15  ;;  %v3058_v30 = vld [vmem:[%s4821_s1 + $0xb4] sm:$0xf]  ;;  %v2259_v31 = vld [vmem:[%s4821_s1 + $0xb8] sm:$0xf0]  ;;  %v2514_v33 = vor.u32 %v3123_v27, %v2513_v25  ;;  %v2198_v34 = vor.u32 %v3042_v28, %v2195_v29  ;;  %v2441_v35 = vld [vmem:[%s4821_s1 + $0x220] sm:$0xf] }
  0x38   : > { %1004 = vmatpush.bf16.msrb.mxu2 %v2230_v42  ;;  %973 = vmatmul.bf16.vlgmr.msra.gmra.mxu3 %v3762_v20  ;;  %v3105_v36 = vld [vmem:[%s4821_s1 + $0x224] sm:$0xf0]  ;;  %v2505_v37 = vld [vmem:[%s4821_s1 + $0x2a0] sm:$0xf]  ;;  %v2262_v38 = vor.u32 %v3058_v30, %v2259_v31  ;;  %v3040_v40 = vld [vmem:[%s4821_s1 + $0x24] sm:$0xf] }
  0x39   : > { %1017 = vmatpush.bf16.msrb.mxu3 %v2294_v46  ;;  %960 = vmatmul.bf16.vlgmr.msra.gmra.mxu2 %v3759_v17  ;;  %v3121_v39 = vld [vmem:[%s4821_s1 + $0x2a4] sm:$0xf0]  ;;  %v2187_v41 = vld [vmem:[%s4821_s1 + $0x28] sm:$0xf0]  ;;  %v3056_v42 = vld [vmem:[%s4821_s1 + $0xa4] sm:$0xf]  ;;  %v2442_v44 = vor.u32 %v3105_v36, %v2441_v35 }
  0x3a   : > { %979 = vmatpush.bf16.msrb.mxu0 %v2474_v52  ;;  %v2251_v43 = vld [vmem:[%s4821_s1 + $0xa8] sm:$0xf0]  ;;  %v2506_v45 = vor.u32 %v3121_v39, %v2505_v37  ;;  %v2190_v46 = vor.u32 %v3040_v40, %v2187_v41  ;;  %v2433_v47 = vld [vmem:[%s4821_s1 + $0x210] sm:$0xf]  ;;  %v3103_v48 = vld [vmem:[%s4821_s1 + $0x214] sm:$0xf0] }
  0x3b   : > { %992 = vmatpush.bf16.msrb.mxu1 %v2538_v54  ;;  %v2497_v49 = vld [vmem:[%s4821_s1 + $0x290] sm:$0xf]  ;;  %v2254_v50 = vor.u32 %v3056_v42, %v2251_v43  ;;  %v3119_v51 = vld [vmem:[%s4821_s1 + $0x294] sm:$0xf0]  ;;  %v3038_v52 = vld [vmem:[%s4821_s1 + $0x14] sm:$0xf]  ;;  %v2434_v56 = vor.u32 %v3103_v48, %v2433_v47 }
  0x3c   : > { %1005 = vmatpush.bf16.msrb.mxu2 %v2222_v55  ;;  %v2179_v53 = vld [vmem:[%s4821_s1 + $0x18] sm:$0xf0]  ;;  %v3054_v54 = vld [vmem:[%s4821_s1 + $0x94] sm:$0xf]  ;;  %v2425_v57 = vld [vmem:[%s4821_s1 + $0x200] sm:$0xf]  ;;  %v2498_v59 = vor.u32 %v3119_v51, %v2497_v49 }
  0x3d   : > { %1018 = vmatpush.bf16.msrb.mxu3 %v2286_v58  ;;  %v2243_v55 = vld [vmem:[%s4821_s1 + $0x98] sm:$0xf0]  ;;  %v3101_v58 = vld [vmem:[%s4821_s1 + $0x204] sm:$0xf0]  ;;  %v2182_v60 = vor.u32 %v3038_v52, %v2179_v53  ;;  %v2489_v61 = vld [vmem:[%s4821_s1 + $0x280] sm:$0xf] }
  0x3e   : > { %980 = vmatpush.bf16.msrb.mxu0 %v2466_v0  ;;  %v3117_v62 = vld [vmem:[%s4821_s1 + $0x284] sm:$0xf0]  ;;  %v3036_v63 = vld [vmem:[%s4821_s1 + $0x4] sm:$0xf]  ;;  %v2246_v0 = vor.u32 %v3054_v54, %v2243_v55  ;;  %v2171_v1 = vld [vmem:[%s4821_s1 + $0x8] sm:$0xf0]  ;;  %v2426_v7 = vor.u32 %v3101_v58, %v2425_v57 }
  0x3f   : > { %993 = vmatpush.bf16.msrb.mxu1 %v2530_v4  ;;  %v3052_v2 = vld [vmem:[%s4821_s1 + $0x84] sm:$0xf]  ;;  %v2235_v3 = vld [vmem:[%s4821_s1 + $0x88] sm:$0xf0]  ;;  %v3082_v4 = vld [vmem:[%s4821_s1 + $0x174] sm:$0xf]  ;;  %v2490_v11 = vor.u32 %v3117_v62, %v2489_v61  ;;  %v2174_v12 = vor.u32 %v3036_v63, %v2171_v1 }
  0x40   : > { %1006 = vmatpush.bf16.msrb.mxu2 %v2214_v5  ;;  %v2355_v5 = vld [vmem:[%s4821_s1 + $0x178] sm:$0xf0]  ;;  %v3098_v6 = vld [vmem:[%s4821_s1 + $0x1f4] sm:$0xf]  ;;  %v336_v18 = vld [vmem:[%s3744_s23 + $0x20] sm:$0xff] }
  0x41   : > { %1019 = vmatpush.bf16.msrb.mxu3 %v2278_v9  ;;  %v2419_v8 = vld [vmem:[%s4821_s1 + $0x1f8] sm:$0xf0]  ;;  %v3114_v9 = vld [vmem:[%s4821_s1 + $0x274] sm:$0xf]  ;;  %v3080_v25 = vld [vmem:[%s4821_s1 + $0x164] sm:$0xf]  ;;  %v3899_v29 = vpack.c.bf16 %v336_v18, %v336_v18 }
  0x42   : > { %981 = vmatpush.bf16.msrb.mxu0 %v2458_v19  ;;  %v2483_v10 = vld [vmem:[%s4821_s1 + $0x278] sm:$0xf0]  ;;  %v3130_v13 = vld [vmem:[%s4821_s1 + $0x2f4] sm:$0xf]  ;;  %v2238_v19 = vor.u32 %v3052_v2, %v2235_v3  ;;  %v2422_v23 = vor.u32 %v3098_v6, %v2419_v8  ;;  %v3096_v27 = vld [vmem:[%s4821_s1 + $0x1e4] sm:$0xf] }
  0x43   : > { %994 = vmatpush.bf16.msrb.mxu1 %v2522_v21  ;;  %v2547_v14 = vld [vmem:[%s4821_s1 + $0x2f8] sm:$0xf0]  ;;  %v2358_v21 = vor.u32 %v3082_v4, %v2355_v5  ;;  %v2486_v24 = vor.u32 %v3114_v9, %v2483_v10  ;;  %v2411_v30 = vld [vmem:[%s4821_s1 + $0x1e8] sm:$0xf0]  ;;  %v3112_v31 = vld [vmem:[%s4821_s1 + $0x264] sm:$0xf] }
  0x44   : > { %1007 = vmatpush.bf16.msrb.mxu2 %v2206_v22  ;;  %v337_v22 = vld [vmem:[%s3744_s23 + $0x28] sm:$0xff]  ;;  %v2550_v28 = vor.u32 %v3130_v13, %v2547_v14  ;;  %v2414_v37 = vor.u32 %v3096_v27, %v2411_v30  ;;  %v3078_v39 = vld [vmem:[%s4821_s1 + $0x154] sm:$0xf]  ;;  %v2339_v40 = vld [vmem:[%s4821_s1 + $0x158] sm:$0xf0]  ;;  %s3254_s23 = smul.u32 48, %s3430_s13 }
  0x45   : > { %1020 = vmatpush.bf16.msrb.mxu3 %v2270_v26  ;;  %v2347_v26 = vld [vmem:[%s4821_s1 + $0x168] sm:$0xf0]  ;;  %v3094_v41 = vld [vmem:[%s4821_s1 + $0x1d4] sm:$0xf]  ;;  %v2403_v43 = vld [vmem:[%s4821_s1 + $0x1d8] sm:$0xf0]  ;;  %v2342_v48 = vor.u32 %v3078_v39, %v2339_v40 }
  0x46   : > { %982 = vmatpush.bf16.msrb.mxu0 %v2450_v32  ;;  %v2475_v32 = vld [vmem:[%s4821_s1 + $0x268] sm:$0xf0]  ;;  %v2350_v36 = vor.u32 %v3080_v25, %v2347_v26  ;;  %v2531_v47 = vld [vmem:[%s4821_s1 + $0x2d8] sm:$0xf0]  ;;  %v3076_v49 = vld [vmem:[%s4821_s1 + $0x144] sm:$0xf]  ;;  %s2098_s27 = scalar_lea.hbm %s4829_s9, %s3254_s23 }
  0x47   : > { %995 = vmatpush.bf16.msrb.mxu1 %v2514_v33  ;;  %v3910_v33 = vpack.c.bf16 %v337_v22, %v337_v22  ;;  %v2539_v35 = vld [vmem:[%s4821_s1 + $0x2e8] sm:$0xf0]  ;;  %v3092_v52 = vld [vmem:[%s4821_s1 + $0x1c4] sm:$0xf]  ;;  %v3074_v61 = vld [vmem:[%s4821_s1 + $0x134] sm:$0xf] }
  0x48   : > { %1008 = vmatpush.bf16.msrb.mxu2 %v2198_v34  ;;  %v3128_v34 = vld [vmem:[%s4821_s1 + $0x2e4] sm:$0xf]  ;;  %v2331_v51 = vld [vmem:[%s4821_s1 + $0x148] sm:$0xf0]  ;;  %v2323_v62 = vld [vmem:[%s4821_s1 + $0x138] sm:$0xf0] }
  0x49   : > { %1021 = vmatpush.bf16.msrb.mxu3 %v2262_v38  ;;  %v2478_v38 = vor.u32 %v3112_v31, %v2475_v32  ;;  %v2542_v42 = vor.u32 %v3128_v34, %v2539_v35  ;;  %v3108_v54 = vld [vmem:[%s4821_s1 + $0x244] sm:$0xf]  ;;  %v2459_v55 = vld [vmem:[%s4821_s1 + $0x248] sm:$0xf0]  ;;  %v2334_v58 = vor.u32 %v3076_v49, %v2331_v51  ;;  %v3090_v63 = vld [vmem:[%s4821_s1 + $0x1b4] sm:$0xf]  ;;  %v2326_v6 = vor.u32 %v3074_v61, %v2323_v62 }
  0x4a   : > { %983 = vmatpush.bf16.msrb.mxu0 %v2442_v44  ;;  %v3110_v44 = vld [vmem:[%s4821_s1 + $0x254] sm:$0xf]  ;;  %v2523_v57 = vld [vmem:[%s4821_s1 + $0x2c8] sm:$0xf0]  ;;  %v2387_v1 = vld [vmem:[%s4821_s1 + $0x1b8] sm:$0xf0] }
  0x4b   : > { %996 = vmatpush.bf16.msrb.mxu1 %v2506_v45  ;;  %v2467_v45 = vld [vmem:[%s4821_s1 + $0x258] sm:$0xf0]  ;;  %v3106_v2 = vld [vmem:[%s4821_s1 + $0x234] sm:$0xf]  ;;  %v3072_v9 = vld [vmem:[%s4821_s1 + $0x124] sm:$0xf] }
  0x4c   : > { %1009 = vmatpush.bf16.msrb.mxu2 %v2190_v46  ;;  %v3126_v46 = vld [vmem:[%s4821_s1 + $0x2d4] sm:$0xf]  ;;  %v2451_v3 = vld [vmem:[%s4821_s1 + $0x238] sm:$0xf0]  ;;  %v2315_v10 = vld [vmem:[%s4821_s1 + $0x128] sm:$0xf0] }
  0x4d   : > { %1022 = vmatpush.bf16.msrb.mxu3 %v2254_v50  ;;  %v2406_v50 = vor.u32 %v3094_v41, %v2403_v43  ;;  %v2534_v53 = vor.u32 %v3126_v46, %v2531_v47  ;;  %v3122_v4 = vld [vmem:[%s4821_s1 + $0x2b4] sm:$0xf]  ;;  %v2515_v5 = vld [vmem:[%s4821_s1 + $0x2b8] sm:$0xf0]  ;;  %v2454_v8 = vor.u32 %v3106_v2, %v2451_v3  ;;  %v2379_v13 = vld [vmem:[%s4821_s1 + $0x1a8] sm:$0xf0]  ;;  %v2318_v22 = vor.u32 %v3072_v9, %v2315_v10 }
  0x4e   : > { %984 = vmatpush.bf16.msrb.mxu0 %v2434_v56  ;;  %v3124_v56 = vld [vmem:[%s4821_s1 + $0x2c4] sm:$0xf]  ;;  %v2443_v18 = vld [vmem:[%s4821_s1 + $0x228] sm:$0xf0]  ;;  %v3070_v25 = vld [vmem:[%s4821_s1 + $0x114] sm:$0xf] }
  0x4f   : > { %997 = vmatpush.bf16.msrb.mxu1 %v2498_v59  ;;  %v3104_v14 = vld [vmem:[%s4821_s1 + $0x224] sm:$0xf]  ;;  %v2307_v26 = vld [vmem:[%s4821_s1 + $0x118] sm:$0xf0]  ;;  %v3086_v27 = vld [vmem:[%s4821_s1 + $0x194] sm:$0xf] }
  0x50   : > { %1010 = vmatpush.bf16.msrb.mxu2 %v2182_v60  ;;  %v2462_v60 = vor.u32 %v3108_v54, %v2459_v55  ;;  %v2371_v30 = vld [vmem:[%s4821_s1 + $0x198] sm:$0xf0]  ;;  %v3102_v31 = vld [vmem:[%s4821_s1 + $0x214] sm:$0xf]  ;;  %v3068_v39 = vld [vmem:[%s4821_s1 + $0x104] sm:$0xf] }
  0x51   : > { %1023 = vmatpush.bf16.msrb.mxu3 %v2246_v0  ;;  %v2526_v0 = vor.u32 %v3124_v56, %v2523_v57  ;;  %v2435_v32 = vld [vmem:[%s4821_s1 + $0x218] sm:$0xf0]  ;;  %v3118_v34 = vld [vmem:[%s4821_s1 + $0x294] sm:$0xf]  ;;  %v2299_v40 = vld [vmem:[%s4821_s1 + $0x108] sm:$0xf0] }
  0x52   : > { %985 = vmatpush.bf16.msrb.mxu0 %v2426_v7  ;;  %v2390_v7 = vor.u32 %v3090_v63, %v2387_v1  ;;  %v2499_v35 = vld [vmem:[%s4821_s1 + $0x298] sm:$0xf0]  ;;  %v3084_v41 = vld [vmem:[%s4821_s1 + $0x184] sm:$0xf]  ;;  %v2363_v43 = vld [vmem:[%s4821_s1 + $0x188] sm:$0xf0] }
  0x53   : > { %998 = vmatpush.bf16.msrb.mxu1 %v2490_v11  ;;  %v3088_v11 = vld [vmem:[%s4821_s1 + $0x1a4] sm:$0xf]  ;;  %v2491_v47 = vld [vmem:[%s4821_s1 + $0x288] sm:$0xf0]  ;;  %v2366_v49 = vor.u32 %v3084_v41, %v2363_v43  ;;  %v3139_v51 = vld [vmem:[%s4823_s3 + $0x38] sm:$0xff]  ;;  %s2102_s29 = sshll.u32 %s2098_s27, 4  ;;  %s2103_s29 = int_to_ptr.hbm [resolvable:$true] %s2102_s29 }
  0x54   : > { %1011 = vmatpush.bf16.msrb.mxu2 %v2174_v12  ;;  %v2518_v12 = vor.u32 %v3122_v4, %v2515_v5  ;;  %v3116_v46 = vld [vmem:[%s4821_s1 + $0x284] sm:$0xf]  ;;  %v440_v54 = vld [vmem:[%s4822_s2] sm:$0x3]  ;;  %v3147_v56 = vld [vmem:[%s4823_s3 + $0x78] sm:$0xff]  ;;  %s2087_s13 = scalar_lea.sflag [#allocation3], %s323_s24 }
  0x55   : > { %1024 = vmatpush.bf16.msrb.mxu3 %v2238_v19  ;;  %986 = vmatmul.bf16.vlgmr.msrb.gmra.mxu0 %v3899_v29  ;;  %v3120_v19 = vld [vmem:[%s4821_s1 + $0x2a4] sm:$0xf]  ;;  %v3142_v10 = vld [vmem:[%s4823_s3 + $0x50] sm:$0xff]  ;;  %s3309_s17 = sshra.s32 %s2103_s29, 4  ;;  %s3315_s23 = scalar_lea.hbm %s4829_s9, 96  ;;  %s3310_s17 = int_to_ptr.hbm [resolvable:$true] %s3309_s17 }
  0x56   : > { %1030 = vmatpush.bf16.msra.mxu0 %v2358_v21  ;;  %999 = vmatmul.bf16.vlgmr.msrb.gmra.mxu1 %v3910_v33  ;;  %v2507_v21 = vld [vmem:[%s4821_s1 + $0x2a8] sm:$0xf0]  ;;  %v3144_v2 = vld [vmem:[%s4823_s3 + $0x60] sm:$0xff]  ;;  %s3311_s21 = scalar_lea.hbm %s3310_s17, 48  ;;  %p3316_p0 = scmp.lt.s32.totalorder %s3310_s17, %s4829_s9 }
  0x57   : > { %1043 = vmatpush.bf16.msra.mxu1 %v2422_v23  ;;  %1012 = vmatmul.bf16.vlgmr.msrb.gmra.mxu2 %v3755_v15  ;;  %v2470_v15 = vor.u32 %v3110_v44, %v2467_v45  ;;  %v2382_v23 = vor.u32 %v3088_v11, %v2379_v13  ;;  %v3100_v44 = vld [vmem:[%s4821_s1 + $0x204] sm:$0xf]  ;;  %v2427_v45 = vld [vmem:[%s4821_s1 + $0x208] sm:$0xf0]  ;;  %p3312_p11 = scmp.ne.s32.totalorder %s3310_s17, %s3311_s21  ;;  %p3317_p1 = scmp.lt.s32.totalorder %s3315_s23, %s3311_s21 }
  0x58   : > { %1056 = vmatpush.bf16.msra.mxu2 %v2486_v24  ;;  %1025 = vmatmul.bf16.vlgmr.msrb.gmra.mxu3 %v3757_v16  ;;  %v2395_v16 = vld [vmem:[%s4821_s1 + $0x1c8] sm:$0xf0]  ;;  %v2446_v24 = vor.u32 %v3104_v14, %v2443_v18 }
  0x59   : > { %1069 = vmatpush.bf16.msra.mxu3 %v2550_v28  ;;  %v2398_v59 = vor.u32 %v3092_v52, %v2395_v16  ;;  %v2510_v28 = vor.u32 %v3120_v19, %v2507_v21  ;;  %v3138_v52 = vld [vmem:[%s4823_s3 + $0x30] sm:$0xff]  ;;  %v3136_v16 = vld [vmem:[%s4823_s3 + $0x20] sm:$0xff]  ;;  %v3141_v18 = vld [vmem:[%s4823_s3 + $0x48] sm:$0xff]  ;;  %p3313_p12 = pnand %p3312_p11, %p3447_p5  ;;  %p3318_p2 = por %p3317_p1, %p3316_p0 }
  0x5a   : > { %1031 = vmatpush.bf16.msra.mxu0 %v2350_v36  ;;  %v2310_v36 = vor.u32 %v3070_v25, %v2307_v26  ;;  %v3140_v25 = vld [vmem:[%s4823_s3 + $0x40] sm:$0xff] }
  0x5b   : > { %1044 = vmatpush.bf16.msra.mxu1 %v2414_v37  ;;  %v2374_v37 = vor.u32 %v3086_v27, %v2371_v30  ;;  %p3314_p13 = pneg %p3313_p12 }
  0x5c   : > { %1057 = vmatpush.bf16.msra.mxu2 %v2478_v38  ;;  %v2438_v38 = vor.u32 %v3102_v31, %v2435_v32 }
  0x5d   : > { %1070 = vmatpush.bf16.msra.mxu3 %v2542_v42  ;;  %v2502_v42 = vor.u32 %v3118_v34, %v2499_v35  ;;  %p3319_p3 = pnand %p3318_p2, %p3314_p13 }
  0x5e   : > { %1032 = vmatpush.bf16.msra.mxu0 %v2342_v48  ;;  %v2302_v48 = vor.u32 %v3068_v39, %v2299_v40 }
  0x5f   : > { %1045 = vmatpush.bf16.msra.mxu1 %v2406_v50  ;;  %v2430_v50 = vor.u32 %v3100_v44, %v2427_v45 }
  0x60   : > { %1058 = vmatpush.bf16.msra.mxu2 %v2470_v15  ;;  %v2494_v15 = vor.u32 %v3116_v46, %v2491_v47  ;;  %v2641_v47 = vld [vmem:[%s4825_s5 + $0x30] sm:$0xf] }
  0x61   : > { %1071 = vmatpush.bf16.msra.mxu3 %v2534_v53  ;;  %v3137_v53 = vld [vmem:[%s4823_s3 + $0x28] sm:$0xff] }
  0x62   : > { %1033 = vmatpush.bf16.msra.mxu0 %v2334_v58  ;;  %v3146_v58 = vld [vmem:[%s4823_s3 + $0x70] sm:$0xff] }
  0x63   : > { %1046 = vmatpush.bf16.msra.mxu1 %v2398_v59  ;;  %v442_v59 = vperm.slane %v440_v54, 0 }
  0x64   : > { %1059 = vmatpush.bf16.msra.mxu2 %v2462_v60  ;;  %v3145_v60 = vld [vmem:[%s4823_s3 + $0x68] sm:$0xff] }
  0x65   : > { %1072 = vmatpush.bf16.msra.mxu3 %v2526_v0 }
  0x66   : > { %1034 = vmatpush.bf16.msra.mxu0 %v2326_v6 }
  0x67   : > { %1047 = vmatpush.bf16.msra.mxu1 %v2390_v7 }
  0x68   : > { %1060 = vmatpush.bf16.msra.mxu2 %v2454_v8  ;;  %v3143_v8 = vld [vmem:[%s4823_s3 + $0x58] sm:$0xff] }
  0x69   : > { %1073 = vmatpush.bf16.msra.mxu3 %v2518_v12 }
  0x6a   : > { %1035 = vmatpush.bf16.msra.mxu0 %v2318_v22 }
  0x6b   : > { %1048 = vmatpush.bf16.msra.mxu1 %v2382_v23 }
  0x6c   : > { %1061 = vmatpush.bf16.msra.mxu2 %v2446_v24 }
  0x6d   : > { %1074 = vmatpush.bf16.msra.mxu3 %v2510_v28  ;;  %v443_v28 = vperm.slane %v440_v54, 1  ;;  %v3151_v54 = vld [vmem:[%s4825_s5 + $0x14] sm:$0xf0] }
  0x6e   : > { %1036 = vmatpush.bf16.msra.mxu0 %v2310_v36 }
  0x6f   : > { %1049 = vmatpush.bf16.msra.mxu1 %v2374_v37 }
  0x70   : > { %1062 = vmatpush.bf16.msra.mxu2 %v2438_v38 }
  0x71   : > { %1075 = vmatpush.bf16.msra.mxu3 %v2502_v42 }
  0x72   : > { %1037 = vmatpush.bf16.msra.mxu0 %v2302_v48  ;;  %v3155_v48 = vld [vmem:[%s4825_s5 + $0x34] sm:$0xf0] }
  0x73   : > { %1050 = vmatpush.bf16.msra.mxu1 %v2366_v49  ;;  %v3154_v49 = vld [vmem:[%s4825_s5 + $0x34] sm:$0xf] }
  0x74   : > { %1063 = vmatpush.bf16.msra.mxu2 %v2430_v50  ;;  %v2642_v50 = vor.u32 %v3155_v48, %v2641_v47  ;;  %v3231_v48 = vld [vmem:[%s4827_s7 + $0x254] sm:$0xf0] }
  0x75   : > { %1076 = vmatpush.bf16.msra.mxu3 %v2494_v15  ;;  %1038 = vmatmul.bf16.vlgmr.msra.gmra.mxu0 %v3759_v17  ;;  %v3135_v17 = vld [vmem:[%s4823_s3 + $0x18] sm:$0xff] }
  0x76   : > { %1218 = vmatpush.bf16.msrb.mxu0 %v3139_v51  ;;  %1051 = vmatmul.bf16.vlgmr.msra.gmra.mxu1 %v3762_v20  ;;  %v3134_v20 = vld [vmem:[%s4823_s3 + $0x10] sm:$0xff]  ;;  %v2643_v15 = vld [vmem:[%s4825_s5 + $0x38] sm:$0xf0]  ;;  %v2633_v51 = vld [vmem:[%s4825_s5 + $0x20] sm:$0xf] }
  0x77   : > { %1064 = vmatmul.bf16.vlgmr.msra.gmra.mxu2 %v3899_v29  ;;  %v3133_v29 = vld [vmem:[%s4823_s3 + $0x8] sm:$0xff]  ;;  %1231 = vmatpush.bf16.msrb.mxu1 %v3147_v56  ;;  %v2627_v56 = vld [vmem:[%s4825_s5 + $0x18] sm:$0xf0] }
  0x78   : > { %1077 = vmatmul.bf16.vlgmr.msra.gmra.mxu3 %v3910_v33  ;;  %v3132_v33 = vld [vmem:[%s4823_s3] sm:$0xff]  ;;  %1308 = vmatpush.bf16.msrb.mxu2 %v2642_v50  ;;  %v2749_v50 = vld [vmem:[%s4827_s7 + $0xd8] sm:$0xf0] }
  0x7a   : > { %1219 = vmatpush.bf16.msrb.mxu0 %v3138_v52  ;;  %v3153_v52 = vld [vmem:[%s4825_s5 + $0x24] sm:$0xf0] }
  0x7b   : > { %1232 = vmatpush.bf16.msrb.mxu1 %v3146_v58 }
  0x7e   : > { %1220 = vmatpush.bf16.msrb.mxu0 %v3137_v53  ;;  %v2646_v53 = vor.u32 %v3154_v49, %v2643_v15  ;;  %v3180_v49 = vld [vmem:[%s4827_s7 + $0xc4] sm:$0xf] }
  0x7f   : > { %1233 = vmatpush.bf16.msrb.mxu1 %v3145_v60  ;;  %v2617_v60 = vld [vmem:[%s4825_s5] sm:$0xf]  ;;  %v3228_v15 = vld [vmem:[%s4827_s7 + $0x244] sm:$0xf] }
  0x80   : > { %1321 = vmatpush.bf16.msrb.mxu3 %v2646_v53 }
  0x82   : > { %1221 = vmatpush.bf16.msrb.mxu0 %v3136_v16  ;;  %v3152_v16 = vld [vmem:[%s4825_s5 + $0x24] sm:$0xf] }
  0x83   : > { %1234 = vmatpush.bf16.msrb.mxu1 %v3144_v2 }
  0x86   : > { %1222 = vmatpush.bf16.msrb.mxu0 %v3135_v17  ;;  %v2635_v17 = vld [vmem:[%s4825_s5 + $0x28] sm:$0xf0] }
  0x87   : > { %1235 = vmatpush.bf16.msrb.mxu1 %v3143_v8  ;;  %v3198_v8 = vld [vmem:[%s4827_s7 + $0x154] sm:$0xf] }
  0x8a   : > { %1223 = vmatpush.bf16.msrb.mxu0 %v3134_v20  ;;  %v2634_v20 = vor.u32 %v3153_v52, %v2633_v51  ;;  %v2941_v51 = vld [vmem:[%s4827_s7 + $0x258] sm:$0xf0] }
  0x8b   : > { %1236 = vmatpush.bf16.msrb.mxu1 %v3142_v10 }
  0x8c   : > { %1309 = vmatpush.bf16.msrb.mxu2 %v2634_v20  ;;  %v3177_v20 = vld [vmem:[%s4827_s7 + $0xa4] sm:$0xf0] }
  0x8e   : > { %1224 = vmatpush.bf16.msrb.mxu0 %v3133_v29  ;;  %v2638_v29 = vor.u32 %v3152_v16, %v2635_v17  ;;  %v2752_v16 = vor.u32 %v3180_v49, %v2749_v50  ;;  %v2723_v17 = vld [vmem:[%s4827_s7 + $0x90] sm:$0xf]  ;;  %v2829_v49 = vld [vmem:[%s4827_s7 + $0x170] sm:$0xf0]  ;;  %v3247_v50 = vld [vmem:[%s4827_s7 + $0x2dc] sm:$0xf] }
  0x8f   : > { %1237 = vmatpush.bf16.msrb.mxu1 %v3141_v18 }
  0x90   : > { %1322 = vmatpush.bf16.msrb.mxu3 %v2638_v29  ;;  %v2915_v29 = vld [vmem:[%s4827_s7 + $0x210] sm:$0xf] }
  0x92   : > { %1225 = vmatpush.bf16.msrb.mxu0 %v3132_v33  ;;  %v2625_v33 = vld [vmem:[%s4825_s5 + $0x10] sm:$0xf] }
  0x93   : > { %1238 = vmatpush.bf16.msrb.mxu1 %v3140_v25  ;;  %v3192_v25 = vld [vmem:[%s4827_s7 + $0x124] sm:$0xf] }
  0xb3   : > { %v948_v57 = vpop.f32.mrf.mxu1 }
  0xb4   : > { %v935_v55 = vpop.f32.mrf.mxu0 }
  0xb5   : > { %v936_v61 = vadd.f32 %v935_v55, %v442_v59  ;;  %v3150_v55 = vld [vmem:[%s4825_s5 + $0x14] sm:$0xf] }
  0xb6   : > { %v2630_v58 = vor.u32 %v3150_v55, %v2627_v56  ;;  %v3174_v55 = vld [vmem:[%s4827_s7 + $0x94] sm:$0xf]  ;;  %v2725_v56 = vld [vmem:[%s4827_s7 + $0xa8] sm:$0xf0] }
  0xb7   : > { %v949_v3 = vadd.f32 %v948_v57, %v936_v61  ;;  %v2626_v57 = vor.u32 %v3151_v54, %v2625_v33  ;;  %v3149_v61 = vld [vmem:[%s4825_s5 + $0x4] sm:$0xf0]  ;;  %v2944_v33 = vor.u32 %v3228_v15, %v2941_v51  ;;  %v3021_v15 = vld [vmem:[%s4827_s7 + $0x2f0] sm:$0xf0] }
  0xb8   : > { %1323 = vmatpush.bf16.msrb.mxu3 %v2630_v58  ;;  %v3225_v54 = vld [vmem:[%s4827_s7 + $0x224] sm:$0xf0]  ;;  %v2917_v58 = vld [vmem:[%s4827_s7 + $0x228] sm:$0xf0] }
  0xb9   : > { %1310 = vmatpush.bf16.msrb.mxu2 %v2626_v57  ;;  %v3222_v57 = vld [vmem:[%s4827_s7 + $0x214] sm:$0xf] }
  0xbb   : > { %v974_v0 = vpop.f32.mrf.mxu3  ;;  %v950_v1 = vpop.f32.mrf.mxu1 }
  0xbc   : > { %v961_v62 = vpop.f32.mrf.mxu2  ;;  %v937_v63 = vpop.f32.mrf.mxu0 }
  0xbd   : > { %v962_v4 = vadd.f32 %v961_v62, %v949_v3  ;;  %v3148_v62 = vld [vmem:[%s4825_s5 + $0x4] sm:$0xf]  ;;  %v2618_v63 = vor.u32 %v3149_v61, %v2617_v60  ;;  %v2819_v3 = vld [vmem:[%s4827_s7 + $0x150] sm:$0xf]  ;;  %v2724_v60 = vor.u32 %v3177_v20, %v2723_v17  ;;  %v2916_v61 = vor.u32 %v3225_v54, %v2915_v29  ;;  %v2803_v20 = vld [vmem:[%s4827_s7 + $0x128] sm:$0xf] }
  0xbe   : > { %v3196_v29 = vld [vmem:[%s4827_s7 + $0x13c] sm:$0xf0]  ;;  %v3024_v54 = vor.u32 %v3247_v50, %v3021_v15  ;;  %v3217_v50 = vld [vmem:[%s4827_s7 + $0x1ec] sm:$0xf]  ;;  %v2901_v15 = vld [vmem:[%s4827_s7 + $0x200] sm:$0xf0] }
  0xbf   : > { %v975_v7 = vadd.f32 %v974_v0, %v962_v4  ;;  %v2619_v0 = vld [vmem:[%s4825_s5 + $0x8] sm:$0xf0]  ;;  %1311 = vmatpush.bf16.msrb.mxu2 %v2618_v63  ;;  %v3201_v4 = vld [vmem:[%s4827_s7 + $0x164] sm:$0xf0]  ;;  %v2699_v63 = vld [vmem:[%s4827_s7 + $0x60] sm:$0xf] }
  0xc0   : > { %v2622_v2 = vor.u32 %v3148_v62, %v2619_v0  ;;  %v2728_v62 = vor.u32 %v3174_v55, %v2725_v56  ;;  %v3171_v0 = vld [vmem:[%s4827_s7 + $0x74] sm:$0xf0]  ;;  %v2995_v55 = vld [vmem:[%s4827_s7 + $0x2a8] sm:$0xf]  ;;  %v3244_v56 = vld [vmem:[%s4827_s7 + $0x2bc] sm:$0xf0] }
  0xc2   : > { %1324 = vmatpush.bf16.msrb.mxu3 %v2622_v2  ;;  %v2920_v2 = vor.u32 %v3222_v57, %v2917_v58  ;;  %v3193_v57 = vld [vmem:[%s4827_s7 + $0x12c] sm:$0xf] }
  0xc3   : > { %v976_v6 = vpop.f32.mrf.mxu3 }
  0xc4   : > { %v963_v5 = vpop.f32.mrf.mxu2  ;;  %v2820_v6 = vor.u32 %v3201_v4, %v2819_v3  ;;  %v3219_v3 = vld [vmem:[%s4827_s7 + $0x1f4] sm:$0xf0]  ;;  %v3168_v4 = vld [vmem:[%s4827_s7 + $0x64] sm:$0xf] }
  0xc5   : > { %v3011_v5 = vld [vmem:[%s4827_s7 + $0x2d0] sm:$0xf] }
  0xc6   : > { %1924 = vmatpush.bf16.msra.mxu2 %v2820_v6  ;;  %v3216_v6 = vld [vmem:[%s4827_s7 + $0x1e4] sm:$0xf] }
  0xd2   : > { %v987_v9 = vpop.f32.mrf.mxu0 }
  0xd3   : > { %v988_v11 = vadd.f32 %v987_v9, %v975_v7  ;;  %v1000_v12 = vpop.f32.mrf.mxu1  ;;  %v3249_v7 = vld [vmem:[%s4827_s7 + $0x2e4] sm:$0xf0]  ;;  %v2821_v9 = vld [vmem:[%s4827_s7 + $0x168] sm:$0xf0] }
  0xd4   : > { %v3012_v10 = vor.u32 %v3249_v7, %v3011_v5  ;;  %v2701_v5 = vld [vmem:[%s4827_s7 + $0x78] sm:$0xf0] }
  0xd5   : > { %v1001_v13 = vadd.f32 %v1000_v12, %v988_v11  ;;  %v2824_v11 = vor.u32 %v3198_v8, %v2821_v9  ;;  %v3246_v12 = vld [vmem:[%s4827_s7 + $0x2d4] sm:$0xf]  ;;  %v2893_v7 = vld [vmem:[%s4827_s7 + $0x1f8] sm:$0xf0]  ;;  %v3294_v8 = vld [vmem:[%s4824_s4] ss:$0 sm:$0xff]  ;;  %v2700_v9 = vor.u32 %v3171_v0, %v2699_v63  ;;  %v2804_v63 = vor.u32 %v3196_v29, %v2803_v20 }
  0xd6   : > { %1937 = vmatpush.bf16.msra.mxu3 %v3012_v10  ;;  %v2996_v0 = vor.u32 %v3244_v56, %v2995_v55  ;;  %v3166_v20 = vld [vmem:[%s4827_s7 + $0x4c] sm:$0xf0]  ;;  %v2875_v29 = vld [vmem:[%s4827_s7 + $0x1b8] sm:$0xf]  ;;  %v3163_v55 = vld [vmem:[%s4827_s7 + $0x3c] sm:$0xf] }
  0xd7   : > { %v1082_v14 = vmax.f32 %v1001_v13, 0.0  ;;  %v3013_v13 = vld [vmem:[%s4827_s7 + $0x2e8] sm:$0xf0]  ;;  %1950 = vmatpush.bf16.msra.mxu0 %v2824_v11  ;;  %v2704_v11 = vor.u32 %v3168_v4, %v2701_v5  ;;  %v2971_v5 = vld [vmem:[%s4827_s7 + $0x278] sm:$0xf] }
  0xd8   : > { %v3016_v18 = vor.u32 %v3246_v12, %v3013_v13  ;;  %v2675_v12 = vld [vmem:[%s4827_s7 + $0x30] sm:$0xf]  ;;  %v3165_v13 = vld [vmem:[%s4827_s7 + $0x44] sm:$0xf0]  ;;  %v2685_v56 = vld [vmem:[%s4827_s7 + $0x50] sm:$0xf0] }
  0xd9   : > { %v1084_v19 = vpack.c.bf16 %v1082_v14, %v1082_v14  ;;  %v2795_v14 = vld [vmem:[%s4827_s7 + $0x120] sm:$0xf] }
  0xda   : > { %v1013_v21 = vpop.f32.mrf.mxu2  ;;  %v989_v23 = vpop.f32.mrf.mxu0  ;;  %1963 = vmatpush.bf16.msra.mxu1 %v3016_v18  ;;  %v2896_v18 = vor.u32 %v3216_v6, %v2893_v7  ;;  %v3238_v6 = vld [vmem:[%s4827_s7 + $0x28c] sm:$0xf0]  ;;  %v3187_v7 = vld [vmem:[%s4827_s7 + $0xfc] sm:$0xf] }
  0xdb   : > { %v1026_v22 = vpop.f32.mrf.mxu3  ;;  %1226 = vmatmul.bf16.vlgmr.msrb.gmra.mxu0 %v1084_v19  ;;  %v1002_v24 = vpop.f32.mrf.mxu1  ;;  %v1014_v30 = vadd.f32 %v1013_v21, %v443_v28  ;;  %v3195_v19 = vld [vmem:[%s4827_s7 + $0x134] sm:$0xf0]  ;;  %v2987_v21 = vld [vmem:[%s4827_s7 + $0x2a0] sm:$0xf] }
  0xdc   : > { %v2796_v23 = vor.u32 %v3195_v19, %v2795_v14  ;;  %v2867_v14 = vld [vmem:[%s4827_s7 + $0x1b0] sm:$0xf]  ;;  %v3213_v19 = vld [vmem:[%s4827_s7 + $0x1c4] sm:$0xf0] }
  0xdd   : > { %v1027_v31 = vadd.f32 %v1026_v22, %v1014_v30  ;;  %v3243_v22 = vld [vmem:[%s4827_s7 + $0x2b4] sm:$0xf0]  ;;  %v2989_v30 = vld [vmem:[%s4827_s7 + $0x2b8] sm:$0xf0] }
  0xde   : > { %v2988_v24 = vor.u32 %v3243_v22, %v2987_v21  ;;  %1925 = vmatpush.bf16.msra.mxu2 %v2796_v23  ;;  %v3162_v21 = vld [vmem:[%s4827_s7 + $0x34] sm:$0xf]  ;;  %v2677_v22 = vld [vmem:[%s4827_s7 + $0x48] sm:$0xf0] }
  0xdf   : > { %v3210_v23 = vld [vmem:[%s4827_s7 + $0x1b4] sm:$0xf] }
  0xe0   : > { %1938 = vmatpush.bf16.msra.mxu3 %v2988_v24  ;;  %v2869_v24 = vld [vmem:[%s4827_s7 + $0x1c8] sm:$0xf0] }
  0xe2   : > { %v1015_v26 = vpop.f32.mrf.mxu2 }
  0xe3   : > { %v1028_v27 = vpop.f32.mrf.mxu3  ;;  %v2797_v26 = vld [vmem:[%s4827_s7 + $0x138] sm:$0xf0] }
  0xe4   : > { %v3240_v27 = vld [vmem:[%s4827_s7 + $0x2a4] sm:$0xf]  ;;  %v2800_v28 = vor.u32 %v3192_v25, %v2797_v26  ;;  %v2676_v26 = vor.u32 %v3165_v13, %v2675_v12  ;;  %v2972_v12 = vor.u32 %v3238_v6, %v2971_v5  ;;  %v2755_v13 = vld [vmem:[%s4827_s7 + $0xc8] sm:$0xf] }
  0xe5   : > { %v2661_v5 = vld [vmem:[%s4827_s7 + $0x20] sm:$0xf0] }
  0xe6   : > { %1951 = vmatpush.bf16.msra.mxu0 %v2800_v28  ;;  %v3159_v28 = vld [vmem:[%s4827_s7 + $0x14] sm:$0xf0] }
  0xf2   : > { %v1039_v32 = vpop.f32.mrf.mxu0 }
  0xf3   : > { %v1052_v34 = vpop.f32.mrf.mxu1  ;;  %v1040_v35 = vadd.f32 %v1039_v32, %v1027_v31  ;;  %v2771_v31 = vld [vmem:[%s4827_s7 + $0xf0] sm:$0xf]  ;;  %v3189_v32 = vld [vmem:[%s4827_s7 + $0x104] sm:$0xf0] }
  0xf5   : > { %v1053_v36 = vadd.f32 %v1052_v34, %v1040_v35  ;;  %v2992_v34 = vor.u32 %v3240_v27, %v2989_v30  ;;  %v2963_v35 = vld [vmem:[%s4827_s7 + $0x270] sm:$0xf]  ;;  %v2651_v27 = vld [vmem:[%s4827_s7] sm:$0xf] }
  0xf7   : > { %1964 = vmatpush.bf16.msra.mxu1 %v2992_v34  ;;  %v2843_v34 = vld [vmem:[%s4827_s7 + $0x180] sm:$0xf] }
  0xfa   : > { %v1065_v37 = vpop.f32.mrf.mxu2  ;;  %v1041_v40 = vpop.f32.mrf.mxu0 }
  0xfb   : > { %v1066_v38 = vadd.f32 %v1065_v37, %v1053_v36  ;;  %v1078_v39 = vpop.f32.mrf.mxu3  ;;  %v1054_v41 = vpop.f32.mrf.mxu1  ;;  %v3237_v36 = vld [vmem:[%s4827_s7 + $0x284] sm:$0xf0]  ;;  %v3186_v37 = vld [vmem:[%s4827_s7 + $0xf4] sm:$0xf] }
  0xfc   : > { %v3234_v40 = vld [vmem:[%s4827_s7 + $0x274] sm:$0xf]  ;;  %v2965_v41 = vld [vmem:[%s4827_s7 + $0x288] sm:$0xf0] }
  0xfd   : > { %v1079_v42 = vadd.f32 %v1078_v39, %v1066_v38  ;;  %v2772_v38 = vor.u32 %v3189_v32, %v2771_v31  ;;  %v2773_v39 = vld [vmem:[%s4827_s7 + $0x108] sm:$0xf0]  ;;  %v2968_v47 = vor.u32 %v3234_v40, %v2965_v41  ;;  %v2868_v31 = vor.u32 %v3213_v19, %v2867_v14  ;;  %v2845_v40 = vld [vmem:[%s4827_s7 + $0x198] sm:$0xf0]  ;;  %v2827_v41 = vld [vmem:[%s4827_s7 + $0x158] sm:$0xf] }
  0xfe   : > { %v2680_v32 = vor.u32 %v3162_v21, %v2677_v22  ;;  %v3184_v14 = vld [vmem:[%s4827_s7 + $0xdc] sm:$0xf0]  ;;  %v2947_v21 = vld [vmem:[%s4827_s7 + $0x248] sm:$0xf] }
  0xff   : > { %v1083_v43 = vmax.f32 %v1079_v42, 0.0  ;;  %v2964_v42 = vor.u32 %v3237_v36, %v2963_v35  ;;  %1926 = vmatpush.bf16.msra.mxu2 %v2772_v38  ;;  %1965 = vmatpush.bf16.msra.mxu1 %v2968_v47  ;;  %v3156_v35 = vld [vmem:[%s4827_s7 + $0x4] sm:$0xf]  ;;  %v2653_v38 = vld [vmem:[%s4827_s7 + $0x18] sm:$0xf0]  ;;  %v2652_v47 = vor.u32 %v3159_v28, %v2651_v27  ;;  %v2756_v27 = vor.u32 %v3184_v14, %v2755_v13 }
 0x100   : > { %v3232_v22 = vld [vmem:[%s4827_s7 + $0x25c] sm:$0xf0] }
 0x101   : > { %v1085_v44 = vpack.c.bf16 %v1083_v43, %v1083_v43  ;;  %v2776_v43 = vor.u32 %v3186_v37, %v2773_v39  ;;  %1939 = vmatpush.bf16.msra.mxu3 %v2964_v42  ;;  %v2872_v37 = vor.u32 %v3210_v23, %v2869_v24  ;;  %v3204_v39 = vld [vmem:[%s4827_s7 + $0x184] sm:$0xf]  ;;  %v3202_v42 = vld [vmem:[%s4827_s7 + $0x16c] sm:$0xf0]  ;;  %v3181_v23 = vld [vmem:[%s4827_s7 + $0xcc] sm:$0xf]  ;;  %v2948_v28 = vor.u32 %v3232_v22, %v2947_v21 }
 0x102   : > { %v1067_v45 = vpop.f32.mrf.mxu2  ;;  %v2757_v24 = vld [vmem:[%s4827_s7 + $0xe0] sm:$0xf0]  ;;  %v2835_v22 = vld [vmem:[%s4827_s7 + $0x160] sm:$0xf] }
 0x103   : > { %v1080_v46 = vpop.f32.mrf.mxu3  ;;  %1239 = vmatmul.bf16.vlgmr.msrb.gmra.mxu1 %v1085_v44  ;;  %v2747_v44 = vld [vmem:[%s4827_s7 + $0xc0] sm:$0xf]  ;;  %v3183_v45 = vld [vmem:[%s4827_s7 + $0xd4] sm:$0xf0]  ;;  %1952 = vmatpush.bf16.msra.mxu0 %v2776_v43 }
 0x104   : > { %v2939_v46 = vld [vmem:[%s4827_s7 + $0x240] sm:$0xf]  ;;  %v2748_v52 = vor.u32 %v3183_v45, %v2747_v44  ;;  %1966 = vmatpush.bf16.msra.mxu1 %v2944_v33  ;;  %v3019_v43 = vld [vmem:[%s4827_s7 + $0x2d8] sm:$0xf]  ;;  %v3250_v45 = vld [vmem:[%s4827_s7 + $0x2ec] sm:$0xf0] }
 0x105   : > { %v2940_v53 = vor.u32 %v3231_v48, %v2939_v46  ;;  %v3199_v46 = vld [vmem:[%s4827_s7 + $0x15c] sm:$0xf]  ;;  %v3020_v17 = vor.u32 %v3250_v45, %v3019_v43  ;;  %v3172_v43 = vld [vmem:[%s4827_s7 + $0x7c] sm:$0xf0] }
 0x106   : > { %1927 = vmatpush.bf16.msra.mxu2 %v2748_v52  ;;  %v2656_v52 = vor.u32 %v3156_v35, %v2653_v38  ;;  %v2832_v33 = vor.u32 %v3199_v46, %v2829_v49  ;;  %v3226_v35 = vld [vmem:[%s4827_s7 + $0x22c] sm:$0xf0]  ;;  %v3223_v38 = vld [vmem:[%s4827_s7 + $0x21c] sm:$0xf]  ;;  %v2899_v46 = vld [vmem:[%s4827_s7 + $0x1e8] sm:$0xf] }
 0x107   : > { %1940 = vmatpush.bf16.msra.mxu3 %v2940_v53  ;;  %1953 = vmatpush.bf16.msra.mxu0 %v2752_v16  ;;  %v2848_v53 = vor.u32 %v3204_v39, %v2845_v40  ;;  %v2828_v16 = vor.u32 %v3202_v42, %v2827_v41  ;;  %v2925_v39 = vld [vmem:[%s4827_s7 + $0x230] sm:$0xf0]  ;;  %v2707_v42 = vld [vmem:[%s4827_s7 + $0x68] sm:$0xf]  ;;  %v2709_v49 = vld [vmem:[%s4827_s7 + $0x80] sm:$0xf0] }
 0x108   : > { %1967 = vmatpush.bf16.msra.mxu1 %v2920_v2  ;;  %v3190_v2 = vld [vmem:[%s4827_s7 + $0x10c] sm:$0xf0]  ;;  %v2928_v45 = vor.u32 %v3223_v38, %v2925_v39  ;;  %v3197_v38 = vld [vmem:[%s4827_s7 + $0x144] sm:$0xf0] }
 0x10a   : > { %1928 = vmatpush.bf16.msra.mxu2 %v2724_v60  ;;  %v2805_v60 = vld [vmem:[%s4827_s7 + $0x140] sm:$0xf0] }
 0x10b   : > { %1941 = vmatpush.bf16.msra.mxu3 %v2916_v61  ;;  %1954 = vmatpush.bf16.msra.mxu0 %v2728_v62  ;;  %v3241_v61 = vld [vmem:[%s4827_s7 + $0x2ac] sm:$0xf]  ;;  %v2997_v62 = vld [vmem:[%s4827_s7 + $0x2c0] sm:$0xf0] }
 0x10c   : > { %1968 = vmatpush.bf16.msra.mxu1 %v2896_v18  ;;  %v3000_v4 = vor.u32 %v3241_v61, %v2997_v62  ;;  %v2877_v61 = vld [vmem:[%s4827_s7 + $0x1d0] sm:$0xf0] }
 0x10e   : > { %1929 = vmatpush.bf16.msra.mxu2 %v2700_v9  ;;  %v3235_v9 = vld [vmem:[%s4827_s7 + $0x27c] sm:$0xf] }
 0x10f   : > { %1955 = vmatpush.bf16.msra.mxu0 %v2704_v11 }
 0x110   : > { %1969 = vmatpush.bf16.msra.mxu1 %v2872_v37  ;;  %v2733_v37 = vld [vmem:[%s4827_s7 + $0xb0] sm:$0xf0] }
 0x112   : > { %1930 = vmatpush.bf16.msra.mxu2 %v2676_v26  ;;  %v2949_v26 = vld [vmem:[%s4827_s7 + $0x260] sm:$0xf0] }
 0x113   : > { %1956 = vmatpush.bf16.msra.mxu0 %v2680_v32  ;;  %v2760_v32 = vor.u32 %v3181_v23, %v2757_v24  ;;  %v3203_v23 = vld [vmem:[%s4827_s7 + $0x174] sm:$0xf0]  ;;  %v3027_v24 = vld [vmem:[%s4827_s7 + $0x2e0] sm:$0xf] }
 0x114   : > { %1970 = vmatpush.bf16.msra.mxu1 %v2848_v53 }
 0x116   : > { %1931 = vmatpush.bf16.msra.mxu2 %v2652_v47  ;;  %v3220_v47 = vld [vmem:[%s4827_s7 + $0x1fc] sm:$0xf0] }
 0x117   : > { %1957 = vmatpush.bf16.msra.mxu0 %v2656_v52  ;;  %v2900_v52 = vor.u32 %v3220_v47, %v2899_v46  ;;  %v3005_v46 = vld [vmem:[%s4827_s7 + $0x2c8] sm:$0xf0] }
 0x118   : > { %2015 = vmatpush.bf16.msrb.mxu1 %v3024_v54  ;;  %v3214_v54 = vld [vmem:[%s4827_s7 + $0x1cc] sm:$0xf0] }
 0x11b   : > { %2002 = vmatpush.bf16.msrb.mxu0 %v2832_v33 }
 0x11c   : > { %2016 = vmatpush.bf16.msrb.mxu1 %v3000_v4  ;;  %v3157_v4 = vld [vmem:[%s4827_s7 + $0xc] sm:$0xf] }
 0x158   : > { %v4157_v59 = vpop.f32.mrf.mxu0 }
 0x159   : > { %v1228_v25 = vadd.f32 %v3294_v8, %v4157_v59  ;;  %v3207_v59 = vld [vmem:[%s4827_s7 + $0x194] sm:$0xf0]  ;;  %v2781_v8 = vld [vmem:[%s4827_s7 + $0x110] sm:$0xf0] }
 0x15a   : > { %v2844_v48 = vor.u32 %v3207_v59, %v2843_v34  ;;  %v2784_v18 = vor.u32 %v3187_v7, %v2781_v8  ;;  %v2923_v59 = vld [vmem:[%s4827_s7 + $0x218] sm:$0xf]  ;;  %v2664_v7 = vor.u32 %v3157_v4, %v2661_v5  ;;  %v3205_v8 = vld [vmem:[%s4827_s7 + $0x18c] sm:$0xf] }
 0x15b   : > { %v2924_v41 = vor.u32 %v3226_v35, %v2923_v59  ;;  %v2836_v35 = vor.u32 %v3203_v23, %v2835_v22  ;;  %v2715_v22 = vld [vmem:[%s4827_s7 + $0x70] sm:$0xf]  ;;  %v3173_v23 = vld [vmem:[%s4827_s7 + $0x84] sm:$0xf0] }
 0x160   : > { %v1229_v1 = vpop.f32.mrf.mxu0 }
 0x161   : > { %v2891_v1 = vld [vmem:[%s4827_s7 + $0x1e0] sm:$0xf] }
 0x162   : > { %v2892_v10 = vor.u32 %v3219_v3, %v2891_v1  ;;  %v2779_v1 = vld [vmem:[%s4827_s7 + $0xf8] sm:$0xf]  ;;  %v2808_v3 = vor.u32 %v3193_v57, %v2805_v60  ;;  %v2876_v57 = vor.u32 %v3214_v54, %v2875_v29  ;;  %v3211_v60 = vld [vmem:[%s4827_s7 + $0x1bc] sm:$0xf] }
 0x163   : > { %v2780_v11 = vor.u32 %v3190_v2, %v2779_v1  ;;  %v2880_v62 = vor.u32 %v3211_v60, %v2877_v61  ;;  %v2851_v1 = vld [vmem:[%s4827_s7 + $0x188] sm:$0xf]  ;;  %v2789_v29 = vld [vmem:[%s4827_s7 + $0x118] sm:$0xf0] }
 0x164   : > { %1942 = vmatpush.bf16.msra.mxu3 %v2892_v10  ;;  %v2973_v10 = vld [vmem:[%s4827_s7 + $0x290] sm:$0xf0]  ;;  %2003 = vmatpush.bf16.msrb.mxu0 %v2808_v3  ;;  %v3208_v3 = vld [vmem:[%s4827_s7 + $0x19c] sm:$0xf0]  ;;  %v2981_v54 = vld [vmem:[%s4827_s7 + $0x298] sm:$0xf0] }
 0x165   : > { %v2976_v19 = vor.u32 %v3235_v9, %v2973_v10  ;;  %v2852_v6 = vor.u32 %v3208_v3, %v2851_v1  ;;  %v2853_v9 = vld [vmem:[%s4827_s7 + $0x1a0] sm:$0xf0]  ;;  %v2765_v1 = vld [vmem:[%s4827_s7 + $0xe8] sm:$0xf0] }
 0x166   : > { %v2856_v10 = vor.u32 %v3205_v8, %v2853_v9  ;;  %v2957_v3 = vld [vmem:[%s4827_s7 + $0x268] sm:$0xf0] }
 0x167   : > { %2017 = vmatpush.bf16.msrb.mxu1 %v2976_v19 }
 0x168   : > { %1943 = vmatpush.bf16.msra.mxu3 %v2868_v31  ;;  %v3178_v31 = vld [vmem:[%s4827_s7 + $0xac] sm:$0xf0]  ;;  %2004 = vmatpush.bf16.msrb.mxu0 %v2784_v18 }
 0x16c   : > { %1944 = vmatpush.bf16.msra.mxu3 %v2844_v48  ;;  %2005 = vmatpush.bf16.msrb.mxu0 %v2760_v32  ;;  %v3169_v48 = vld [vmem:[%s4827_s7 + $0x6c] sm:$0xf]  ;;  %v3029_v32 = vld [vmem:[%s4827_s7 + $0x2f8] sm:$0xf0] }
 0x16d   : > { %v2712_v53 = vor.u32 %v3169_v48, %v2709_v49 }
 0x180   : > { %v1240_v30 = vpop.f32.mrf.mxu1 }
 0x181   : > { %v1241_v36 = vadd.f32 %v1240_v30, %v1228_v25  ;;  %v3229_v25 = vld [vmem:[%s4827_s7 + $0x24c] sm:$0xf]  ;;  %v2731_v30 = vld [vmem:[%s4827_s7 + $0x98] sm:$0xf] }
 0x182   : > { %v2952_v34 = vor.u32 %v3229_v25, %v2949_v26  ;;  %v2732_v40 = vor.u32 %v3178_v31, %v2731_v30  ;;  %v3251_v25 = vld [vmem:[%s4827_s7 + $0x2f4] sm:$0xf0]  ;;  %v3200_v26 = vld [vmem:[%s4827_s7 + $0x164] sm:$0xf] }
 0x183   : > { %v1244_v44 = vmax.f32 %v1241_v36, 0.0  ;;  %v3175_v36 = vld [vmem:[%s4827_s7 + $0x9c] sm:$0xf]  ;;  %v3248_v31 = vld [vmem:[%s4827_s7 + $0x2e4] sm:$0xf] }
 0x184   : > { %2018 = vmatpush.bf16.msrb.mxu1 %v2952_v34 }
 0x185   : > { %v1245_v51 = vpack.c.bf16 %v1244_v44, %v1244_v44  ;;  %v2736_v44 = vor.u32 %v3175_v36, %v2733_v37  ;;  %v3028_v36 = vor.u32 %v3251_v25, %v3027_v24  ;;  %v2811_v37 = vld [vmem:[%s4827_s7 + $0x130] sm:$0xf] }
 0x186   : > { %v2812_v49 = vor.u32 %v3197_v38, %v2811_v37  ;;  %v2691_v37 = vld [vmem:[%s4827_s7 + $0x40] sm:$0xf]  ;;  %v3167_v38 = vld [vmem:[%s4827_s7 + $0x54] sm:$0xf0] }
 0x187   : > { %2647 = vmatmul.msk.bf16.vlgmr.msrb.gmra.mxu2 %vm1300_vm0, %v1245_v51  ;;  %2648 = vmatmul.msk.bf16.vlgmr.msrb.gmra.mxu3 %vm1300_vm0, %v1245_v51  ;;  %v2708_v51 = vor.u32 %v3172_v43, %v2707_v42  ;;  %v3245_v42 = vld [vmem:[%s4827_s7 + $0x2c4] sm:$0xf0]  ;;  %v3194_v43 = vld [vmem:[%s4827_s7 + $0x134] sm:$0xf] }
 0x188   : > { %v1242_v58 = vpop.f32.mrf.mxu1  ;;  %1976 = vmatpush.bf16.msrb.mxu2 %v2828_v16  ;;  %1989 = vmatpush.bf16.msrb.mxu3 %v3020_v17  ;;  %v2904_v16 = vor.u32 %v3217_v50, %v2901_v15  ;;  %v2683_v17 = vld [vmem:[%s4827_s7 + $0x38] sm:$0xf]  ;;  %v2787_v15 = vld [vmem:[%s4827_s7 + $0x100] sm:$0xf] }
 0x189   : > { %2006 = vmatpush.bf16.msrb.mxu0 %v2736_v44  ;;  %2019 = vmatpush.bf16.msrb.mxu1 %v2928_v45  ;;  %v2684_v33 = vor.u32 %v3166_v20, %v2683_v17  ;;  %v2688_v58 = vor.u32 %v3163_v55, %v2685_v56  ;;  %v2813_v44 = vld [vmem:[%s4827_s7 + $0x148] sm:$0xf0]  ;;  %v3242_v45 = vld [vmem:[%s4827_s7 + $0x2b4] sm:$0xf]  ;;  %v3239_v17 = vld [vmem:[%s4827_s7 + $0x294] sm:$0xf0] }
 0x18a   : > { %v3188_v20 = vld [vmem:[%s4827_s7 + $0x104] sm:$0xf] }
 0x18b   : > { %v2792_v60 = vor.u32 %v3188_v20, %v2789_v29  ;;  %v3206_v20 = vld [vmem:[%s4827_s7 + $0x194] sm:$0xf]  ;;  %v2861_v29 = vld [vmem:[%s4827_s7 + $0x1a8] sm:$0xf0] }
 0x18c   : > { %1977 = vmatpush.bf16.msrb.mxu2 %v2804_v63  ;;  %1990 = vmatpush.bf16.msrb.mxu3 %v2996_v0  ;;  %v2659_v63 = vld [vmem:[%s4827_s7 + $0x8] sm:$0xf]  ;;  %v3160_v0 = vld [vmem:[%s4827_s7 + $0x1c] sm:$0xf0] }
 0x18d   : > { %2007 = vmatpush.bf16.msrb.mxu0 %v2712_v53  ;;  %2020 = vmatpush.bf16.msrb.mxu1 %v2904_v16  ;;  %v2660_v2 = vor.u32 %v3160_v0, %v2659_v63  ;;  %v3008_v53 = vor.u32 %v3242_v45, %v3005_v46  ;;  %v2979_v16 = vld [vmem:[%s4827_s7 + $0x280] sm:$0xf]  ;;  %v3233_v63 = vld [vmem:[%s4827_s7 + $0x264] sm:$0xf0]  ;;  %v3182_v0 = vld [vmem:[%s4827_s7 + $0xd4] sm:$0xf] }
 0x18e   : > { %v2980_v56 = vor.u32 %v3239_v17, %v2979_v16  ;;  %v2768_v8 = vor.u32 %v3182_v0, %v2765_v1  ;;  %v3212_v45 = vld [vmem:[%s4827_s7 + $0x1c4] sm:$0xf]  ;;  %v2885_v46 = vld [vmem:[%s4827_s7 + $0x1d8] sm:$0xf0]  ;;  %v3158_v16 = vld [vmem:[%s4827_s7 + $0x14] sm:$0xf] }
 0x18f   : > { %v2669_v17 = vld [vmem:[%s4827_s7 + $0x28] sm:$0xf0] }
 0x190   : > { %1978 = vmatpush.bf16.msrb.mxu2 %v2780_v11  ;;  %1991 = vmatpush.bf16.msrb.mxu3 %v2972_v12  ;;  %v1254_v11 = vld [vmem:[%s4826_s6] sm:$0x3] }
 0x191   : > { %2008 = vmatpush.bf16.msrb.mxu0 %v2688_v58  ;;  %2021 = vmatpush.bf16.msrb.mxu1 %v2880_v62  ;;  %v1256_v12 = vperm.slane %v1254_v11, 0  ;;  %v1257_v13 = vperm.slane %v1254_v11, 1  ;;  %v3185_v58 = vld [vmem:[%s4827_s7 + $0xe4] sm:$0xf0]  ;;  %v2955_v62 = vld [vmem:[%s4827_s7 + $0x250] sm:$0xf] }
 0x192   : > { %v2956_v5 = vor.u32 %v3233_v63, %v2955_v62  ;;  %v3227_v11 = vld [vmem:[%s4827_s7 + $0x234] sm:$0xf0] }
 0x194   : > { %1979 = vmatpush.bf16.msrb.mxu2 %v2756_v27  ;;  %1992 = vmatpush.bf16.msrb.mxu3 %v2948_v28  ;;  %v2837_v27 = vld [vmem:[%s4827_s7 + $0x178] sm:$0xf0] }
 0x195   : > { %2009 = vmatpush.bf16.msrb.mxu0 %v2664_v7  ;;  %2022 = vmatpush.bf16.msrb.mxu1 %v2856_v10  ;;  %v2840_v39 = vor.u32 %v3200_v26, %v2837_v27  ;;  %v3179_v7 = vld [vmem:[%s4827_s7 + $0xb4] sm:$0xf0]  ;;  %v2931_v10 = vld [vmem:[%s4827_s7 + $0x220] sm:$0xf]  ;;  %v2907_v26 = vld [vmem:[%s4827_s7 + $0x1f0] sm:$0xf] }
 0x196   : > { %v3221_v27 = vld [vmem:[%s4827_s7 + $0x204] sm:$0xf0] }
 0x198   : > { %1980 = vmatpush.bf16.msrb.mxu2 %v2732_v40  ;;  %1993 = vmatpush.bf16.msrb.mxu3 %v2924_v41  ;;  %v3032_v40 = vor.u32 %v3248_v31, %v3029_v32  ;;  %v3003_v41 = vld [vmem:[%s4827_s7 + $0x2b0] sm:$0xf]  ;;  %v3218_v31 = vld [vmem:[%s4827_s7 + $0x1f4] sm:$0xf]  ;;  %v2909_v32 = vld [vmem:[%s4827_s7 + $0x208] sm:$0xf0] }
 0x199   : > { %v3004_v50 = vor.u32 %v3245_v42, %v3003_v41  ;;  %v2883_v41 = vld [vmem:[%s4827_s7 + $0x1c0] sm:$0xf]  ;;  %v3215_v42 = vld [vmem:[%s4827_s7 + $0x1d4] sm:$0xf0] }
 0x19c   : > { %1981 = vmatpush.bf16.msrb.mxu2 %v2708_v51  ;;  %1994 = vmatpush.bf16.msrb.mxu3 %v2900_v52  ;;  %v3191_v51 = vld [vmem:[%s4827_s7 + $0x114] sm:$0xf0]  ;;  %v2816_v52 = vor.u32 %v3194_v43, %v2813_v44  ;;  %v3164_v43 = vld [vmem:[%s4827_s7 + $0x44] sm:$0xf]  ;;  %v2693_v44 = vld [vmem:[%s4827_s7 + $0x58] sm:$0xf0] }
 0x19d   : > { %v2788_v55 = vor.u32 %v3191_v51, %v2787_v15  ;;  %v2696_v15 = vor.u32 %v3164_v43, %v2693_v44  ;;  %v2888_v51 = vor.u32 %v3212_v45, %v2885_v46 }
 0x1a0   : > { %1982 = vmatpush.bf16.msrb.mxu2 %v2684_v33  ;;  %1995 = vmatpush.bf16.msrb.mxu3 %v2876_v57  ;;  %v3236_v33 = vld [vmem:[%s4827_s7 + $0x284] sm:$0xf]  ;;  %v2763_v57 = vld [vmem:[%s4827_s7 + $0xd0] sm:$0xf] }
 0x1a1   : > { %v2984_v61 = vor.u32 %v3236_v33, %v2981_v54  ;;  %v2764_v4 = vor.u32 %v3185_v58, %v2763_v57  ;;  %v1430_v57 = vld [vmem:[%s4828_s8] sm:$0x3f] }
 0x1a2   : > { %v1433_v58 = vperm.slane %v1430_v57, 1  ;;  %v1432_v63 = vperm.slane %v1430_v57, 0 }
 0x1a4   : > { %1983 = vmatpush.bf16.msrb.mxu2 %v2660_v2  ;;  %1996 = vmatpush.bf16.msrb.mxu3 %v2852_v6  ;;  %v3230_v2 = vld [vmem:[%s4827_s7 + $0x254] sm:$0xf]  ;;  %v2739_v6 = vld [vmem:[%s4827_s7 + $0xa0] sm:$0xf] }
 0x1a5   : > { %v2960_v9 = vor.u32 %v3230_v2, %v2957_v3 }
 0x20a   : > { %v1313_v14 = vpop.f32.mrf.mxu2  ;;  %v1326_v18 = vpop.f32.mrf.mxu3 }
 0x20b   : > { %v1314_v19 = vadd.f32 %v1313_v14, %v1256_v12  ;;  %v1327_v21 = vadd.f32 %v1326_v18, %v1257_v13  ;;  %v3176_v12 = vld [vmem:[%s4827_s7 + $0xa4] sm:$0xf]  ;;  %v2741_v13 = vld [vmem:[%s4827_s7 + $0xb8] sm:$0xf0] }
 0x20c   : > { %v3224_v14 = vld [vmem:[%s4827_s7 + $0x224] sm:$0xf]  ;;  %v2933_v18 = vld [vmem:[%s4827_s7 + $0x238] sm:$0xf0]  ;;  %v2744_v24 = vor.u32 %v3176_v12, %v2741_v13 }
 0x20d   : > { %v1330_v28 = vmax.f32 %v1314_v19, 0.0  ;;  %v1331_v30 = vmax.f32 %v1327_v21, 0.0  ;;  %v2740_v19 = vor.u32 %v3179_v7, %v2739_v6  ;;  %v2932_v21 = vor.u32 %v3227_v11, %v2931_v10 }
 0x20e   : > { %v2936_v25 = vor.u32 %v3224_v14, %v2933_v18  ;;  %v1435_v7 = vperm.slane %v1430_v57, 3  ;;  %v1434_v11 = vperm.slane %v1430_v57, 2 }
 0x20f   : > { %v4588_v34 = vpack.c.bf16 %v1330_v28, %v1330_v28  ;;  %v4590_v59 = vpack.c.bf16 %v1331_v30, %v1331_v30  ;;  %v3170_v28 = vld [vmem:[%s4827_s7 + $0x74] sm:$0xf]  ;;  %v2717_v30 = vld [vmem:[%s4827_s7 + $0x88] sm:$0xf0] }
 0x211   : > { %1932 = vmatmul.bf16.vlgmr.msra.gmra.mxu2 %v4588_v34  ;;  %1945 = vmatmul.bf16.vlgmr.msra.gmra.mxu3 %v4590_v59 }
 0x212   : > { %1958 = vmatmul.bf16.vlgmr.msra.gmra.mxu0 %v4588_v34  ;;  %1971 = vmatmul.bf16.vlgmr.msra.gmra.mxu1 %v4590_v59  ;;  %v1315_v47 = vpop.f32.mrf.mxu2  ;;  %v1328_v48 = vpop.f32.mrf.mxu3 }
 0x213   : > { %2028 = vmatpush.bf16.msra.mxu2 %v2836_v35  ;;  %2041 = vmatpush.bf16.msra.mxu3 %v3028_v36  ;;  %v2716_v35 = vor.u32 %v3173_v23, %v2715_v22  ;;  %v2908_v36 = vor.u32 %v3221_v27, %v2907_v26  ;;  %v2692_v47 = vor.u32 %v3167_v38, %v2691_v37 }
 0x214   : > { %2054 = vmatpush.bf16.msra.mxu0 %v2840_v39  ;;  %2067 = vmatpush.bf16.msra.mxu1 %v3032_v40  ;;  %v2720_v39 = vor.u32 %v3170_v28, %v2717_v30  ;;  %v2912_v40 = vor.u32 %v3218_v31, %v2909_v32  ;;  %v2884_v48 = vor.u32 %v3215_v42, %v2883_v41  ;;  %v1436_v30 = vperm.slane %v1430_v57, 4 }
 0x217   : > { %2029 = vmatpush.bf16.msra.mxu2 %v2812_v49  ;;  %2042 = vmatpush.bf16.msra.mxu3 %v3004_v50  ;;  %v2667_v49 = vld [vmem:[%s4827_s7 + $0x10] sm:$0xf]  ;;  %v3161_v50 = vld [vmem:[%s4827_s7 + $0x24] sm:$0xf0] }
 0x218   : > { %2055 = vmatpush.bf16.msra.mxu0 %v2816_v52  ;;  %2068 = vmatpush.bf16.msra.mxu1 %v3008_v53  ;;  %v2859_v52 = vld [vmem:[%s4827_s7 + $0x190] sm:$0xf]  ;;  %v3209_v53 = vld [vmem:[%s4827_s7 + $0x1a4] sm:$0xf0]  ;;  %v2668_v33 = vor.u32 %v3161_v50, %v2667_v49 }
 0x219   : > { %v2860_v54 = vor.u32 %v3209_v53, %v2859_v52 }
 0x21b   : > { %2030 = vmatpush.bf16.msra.mxu2 %v2788_v55  ;;  %2043 = vmatpush.bf16.msra.mxu3 %v2980_v56  ;;  %v2672_v55 = vor.u32 %v3158_v16, %v2669_v17  ;;  %v2864_v56 = vor.u32 %v3206_v20, %v2861_v29 }
 0x21c   : > { %2056 = vmatpush.bf16.msra.mxu0 %v2792_v60  ;;  %2069 = vmatpush.bf16.msra.mxu1 %v2984_v61 }
 0x21f   : > { %2031 = vmatpush.bf16.msra.mxu2 %v2764_v4  ;;  %2044 = vmatpush.bf16.msra.mxu3 %v2956_v5 }
 0x220   : > { %2057 = vmatpush.bf16.msra.mxu0 %v2768_v8  ;;  %2070 = vmatpush.bf16.msra.mxu1 %v2960_v9 }
 0x221   : > { %1984 = vmatmul.bf16.vlgmr.msrb.gmra.mxu2 %v4588_v34  ;;  %1997 = vmatmul.bf16.vlgmr.msrb.gmra.mxu3 %v4590_v59 }
 0x222   : > { %2010 = vmatmul.bf16.vlgmr.msrb.gmra.mxu0 %v4588_v34  ;;  %2023 = vmatmul.bf16.vlgmr.msrb.gmra.mxu1 %v4590_v59 }
 0x223   : > { %2032 = vmatpush.bf16.msra.mxu2 %v2740_v19  ;;  %2045 = vmatpush.bf16.msra.mxu3 %v2932_v21 }
 0x224   : > { %2058 = vmatpush.bf16.msra.mxu0 %v2744_v24  ;;  %2071 = vmatpush.bf16.msra.mxu1 %v2936_v25  ;;  %v1437_v25 = vperm.slane %v1430_v57, 5 }
 0x227   : > { %2033 = vmatpush.bf16.msra.mxu2 %v2716_v35  ;;  %2046 = vmatpush.bf16.msra.mxu3 %v2908_v36 }
 0x228   : > { %2059 = vmatpush.bf16.msra.mxu0 %v2720_v39  ;;  %2072 = vmatpush.bf16.msra.mxu1 %v2912_v40 }
 0x22b   : > { %2034 = vmatpush.bf16.msra.mxu2 %v2692_v47  ;;  %2047 = vmatpush.bf16.msra.mxu3 %v2884_v48 }
 0x22c   : > { %2060 = vmatpush.bf16.msra.mxu0 %v2696_v15  ;;  %2073 = vmatpush.bf16.msra.mxu1 %v2888_v51 }
 0x22f   : > { %2035 = vmatpush.bf16.msra.mxu2 %v2668_v33  ;;  %2048 = vmatpush.bf16.msra.mxu3 %v2860_v54 }
 0x230   : > { %2061 = vmatpush.bf16.msra.mxu0 %v2672_v55  ;;  %2074 = vmatpush.bf16.msra.mxu1 %v2864_v56 }
 0x232   : > { %2036 = vmatmul.bf16.vlgmr.msra.gmra.mxu2 %v4588_v34  ;;  %2049 = vmatmul.bf16.vlgmr.msra.gmra.mxu3 %v4590_v59 }
 0x233   : > { %2062 = vmatmul.bf16.vlgmr.msra.gmra.mxu0 %v4588_v34  ;;  %2075 = vmatmul.bf16.vlgmr.msra.gmra.mxu1 %v4590_v59 }
 0x28f   : > { %v1959_v60 = vpop.f32.mrf.mxu0  ;;  %v1972_v61 = vpop.f32.mrf.mxu1 }
 0x290   : > { %v1960_v62 = vadd.f32 %v1959_v60, %v1433_v58 }
 0x292   : > { %v1973_v0 = vadd.f32 %v1972_v61, %v1960_v62 }
 0x294   : > { %2081 = vst [vmem:[%s4778_s26 + $0x8] sm:$0xff] %v1973_v0  ;;  %v1933_v34 = vpop.f32.mrf.mxu2  ;;  %v1946_v59 = vpop.f32.mrf.mxu3 }
 0x295   : > { %v1934_v1 = vadd.f32 %v1933_v34, %v1432_v63 }
 0x297   : > { %v1947_v2 = vadd.f32 %v1946_v59, %v1934_v1  ;;  %v1961_v3 = vpop.f32.mrf.mxu0  ;;  %v1974_v4 = vpop.f32.mrf.mxu1 }
 0x299   : > { %2080 = vst [vmem:[%s4778_s26] sm:$0xff] %v1947_v2 }
 0x29c   : > { %v1935_v5 = vpop.f32.mrf.mxu2  ;;  %v1948_v6 = vpop.f32.mrf.mxu3 }
 0x29f   : > { %v2011_v8 = vpop.f32.mrf.mxu0  ;;  %v2024_v9 = vpop.f32.mrf.mxu1 }
 0x2a0   : > { %v2012_v10 = vadd.f32 %v2011_v8, %v1435_v7 }
 0x2a2   : > { %v2025_v12 = vadd.f32 %v2024_v9, %v2012_v10 }
 0x2a4   : > { %2083 = vst [vmem:[%s4778_s26 + $0x18] sm:$0xff] %v2025_v12  ;;  %v1985_v13 = vpop.f32.mrf.mxu2  ;;  %v1998_v14 = vpop.f32.mrf.mxu3 }
 0x2a5   : > { %v1986_v18 = vadd.f32 %v1985_v13, %v1434_v11 }
 0x2a7   : > { %v1999_v19 = vadd.f32 %v1998_v14, %v1986_v18  ;;  %v2013_v21 = vpop.f32.mrf.mxu0  ;;  %v2026_v22 = vpop.f32.mrf.mxu1 }
 0x2a9   : > { %2082 = vst [vmem:[%s4778_s26 + $0x10] sm:$0xff] %v1999_v19 }
 0x2ac   : > { %v1987_v23 = vpop.f32.mrf.mxu2  ;;  %v2000_v24 = vpop.f32.mrf.mxu3 }
 0x2b0   : > { %v2063_v26 = vpop.f32.mrf.mxu0  ;;  %v2076_v27 = vpop.f32.mrf.mxu1 }
 0x2b1   : > { %v2064_v28 = vadd.f32 %v2063_v26, %v1437_v25 }
 0x2b3   : > { %v2077_v31 = vadd.f32 %v2076_v27, %v2064_v28 }
 0x2b5   : > { %2085 = vst [vmem:[%s4778_s26 + $0x28] sm:$0xff] %v2077_v31  ;;  %v2037_v32 = vpop.f32.mrf.mxu2  ;;  %v2050_v35 = vpop.f32.mrf.mxu3 }
 0x2b6   : > { %v2038_v36 = vadd.f32 %v2037_v32, %v1436_v30 }
 0x2b8   : > { %v2051_v37 = vadd.f32 %v2050_v35, %v2038_v36  ;;  %v2065_v38 = vpop.f32.mrf.mxu0  ;;  %v2078_v39 = vpop.f32.mrf.mxu1 }
 0x2ba   : > { %2084 = vst [vmem:[%s4778_s26 + $0x20] sm:$0xff] %v2051_v37 }
 0x2bb   : > { %3322 = shalt.err (!%p3319_p3)
}
 0x2bc   : > { %3255 = dma.vmem_to_hbm [thread:$0]  (%p3447_p5), %s2101_s28, 768, %s2103_s29, %s2087_s13  }
 0x2bd   : > { %v2039_v40 = vpop.f32.mrf.mxu2  ;;  %v2052_v41 = vpop.f32.mrf.mxu3 }
 0x2be PF: > { %p3261_p4 = scmp.ge.s32.totalorder %s3357_s12, 2  ;;  %s2114_s24 = sand.u32 1, %s3345_s30  }
 0x2bf   : > { %s2115_s26 = scalar_lea.sflag [#allocation3], %s2114_s24 }
 0x2c0   : > { %p3258_p7 = pnand %p3261_p4, %p3451_p6 }
 0x2c2   : > { %p3259_p8 = pneg %p3258_p7 }
 0x2c4   : > { %3340 = dma.done.wait (%p3259_p8), %s2115_s26, 768  }
 0x2c5   : > { %3342 = vsyncadd (%p3259_p8), %s2115_s26, 4294966528  ;;  %p19_p5 = scmp.ge.s32.totalorder %s3434_s15, 4   ;;  %s4832_s30 = smov %s3349_s10 }
 0x2c6   : > { %s4833_s10 = smov %s3353_s11  ;;  %s4834_s11 = smov %s3445_s18 }
 0x2c7   : > { %s4835_s12 = smov %s3434_s15  ;;  %21 = sbr.rel (!%p19_p5) target bundleno = 3 (0x3), region = 91 }
 0x2cc   :  { %2121 = vsyncpa [#allocation3], 1 }
 0x2cd   :  { %2123 = vsyncpa [#allocation3 + $0x1], 1 }

</bundles_post_ra>
